<compile_context>
chip_gen: v7x
topology: tpu7x:2x2x1
jax: 0.10.0
libtpu: 0.0.40
codegen_flags: <defaults>
</compile_context>

<pallas_src>
import numpy as np
import jax
import jax.numpy as jnp
from jax.experimental import pallas as pl
from jax.experimental.pallas import tpu as pltpu


# --------------------------------------------------------------------------
# VMEM sizing helper (generation-aware: v5e/v6e 128 MiB, v7x 64 MiB per TC)
# --------------------------------------------------------------------------
def _vmem_budget_bytes():
    cap = 64 << 20
    try:
        info = pltpu.get_tpu_info()
        cap = int(getattr(info, "vmem_capacity_bytes", cap))
    except Exception:
        pass
    return cap // 2          # leave generous headroom for the compiler


# --------------------------------------------------------------------------
# Fused kernel: everything resident in VMEM, one grid step.
# --------------------------------------------------------------------------
def _fused_gcn_kernel(a_ref, x_ref, w1_ref, w2_ref, o_ref):
    a = a_ref[...]                                             # [N, N] f32

    # Layer 1: relu(A @ (X @ W1))
    xw1 = jnp.dot(x_ref[...], w1_ref[...],
                  preferred_element_type=jnp.float32)          # [N, hid]
    h = jnp.maximum(jnp.dot(a, xw1,
                            preferred_element_type=jnp.float32), 0.0)

    # Layer 2: A @ (H @ W2)
    hw2 = jnp.dot(h, w2_ref[...],
                  preferred_element_type=jnp.float32)          # [N, out]
    z = jnp.dot(a, hw2, preferred_element_type=jnp.float32)    # [N, out]

    # log_softmax over the class axis (no padding -> no masking needed).
    m = jnp.max(z, axis=1, keepdims=True)
    s = z - m
    lse = jnp.log(jnp.sum(jnp.exp(s), axis=1, keepdims=True))
    o_ref[...] = s - lse


# --------------------------------------------------------------------------
# Wrapper
# --------------------------------------------------------------------------
def my_gcn_forward(a_dense, x, w1, w2):
    """log_softmax( A @ (relu(A @ (x @ W1)) @ W2), axis=1 ) -- fused kernel."""
    n = a_dense.shape[0]
    in_size = x.shape[1]
    hid = w1.shape[1]
    out_size = w2.shape[1]
    assert a_dense.shape == (n, n)
    assert x.shape == (n, in_size)
    assert w1.shape == (in_size, hid)
    assert w2.shape == (hid, out_size)

    a32 = a_dense.astype(jnp.float32)
    x32 = x.astype(jnp.float32)
    w1f = w1.astype(jnp.float32)
    w2f = w2.astype(jnp.float32)

    # Fully-resident working set (inputs + output + in-kernel intermediates).
    resident_bytes = 4 * (n * n + n * in_size + in_size * hid + hid * out_size
                          + 2 * n * hid + 2 * n * out_size)
    budget = _vmem_budget_bytes()
    assert resident_bytes < budget, (
        "working set too large for the fully-resident fused kernel; "
        "use the tiled/CSR path (see TODO).")

    flops = 2 * (n * in_size * hid + n * n * hid
                 + n * hid * out_size + n * n * out_size)
    bytes_accessed = 4 * (n * n + n * in_size + in_size * hid
                          + hid * out_size + n * out_size)

    grid_spec = pltpu.PrefetchScalarGridSpec(
        num_scalar_prefetch=0,
        grid=(1,),
        in_specs=[
            pl.BlockSpec((n, n), lambda i: (0, 0)),             # A (resident)
            pl.BlockSpec((n, in_size), lambda i: (0, 0)),        # X
            pl.BlockSpec((in_size, hid), lambda i: (0, 0)),      # W1
            pl.BlockSpec((hid, out_size), lambda i: (0, 0)),     # W2
        ],
        out_specs=pl.BlockSpec((n, out_size), lambda i: (0, 0)),
    )

    return pl.pallas_call(
        _fused_gcn_kernel,
        out_shape=jax.ShapeDtypeStruct((n, out_size), jnp.float32),
        grid_spec=grid_spec,
        compiler_params=pltpu.CompilerParams(
            dimension_semantics=("arbitrary",),
            vmem_limit_bytes=budget),
        cost_estimate=pl.CostEstimate(
            flops=flops,
            transcendentals=n * out_size + n,
            bytes_accessed=bytes_accessed),
    )(a32, x32, w1f, w2f)


# --------------------------------------------------------------------------
# Deterministic in-script graph / data
# --------------------------------------------------------------------------
def build_csr_ring_graph(n):
    """Sym-normalized ring graph with self loops, as CSR (AR, AC, AVa)."""
    AR = np.zeros(n + 1, dtype=np.int32)
    AC, AVa = [], []
    for i in range(n):
        neigh = sorted({(i - 1) % n, i, (i + 1) % n})
        for j in neigh:
            AC.append(j)
            AVa.append(1.0 / 3.0)          # deg = 3 everywhere -> 1/sqrt(3*3)
        AR[i + 1] = AR[i] + len(neigh)
    return AR, np.asarray(AC, np.int32), np.asarray(AVa, np.float32)


def csr_to_dense(AR, AC, AVa, n):
    dense = np.zeros((n, n), dtype=np.float32)
    for r in range(n):
        for k in range(AR[r], AR[r + 1]):
            dense[r, AC[k]] = AVa[k]
    return dense


if __name__ == "__main__":
    N, IN_SIZE, HID_SIZE, OUT_SIZE = 256, 32, 32, 16

    # Sparse adjacency (CSR) built in-script; `offset` is only a work-partition
    # hint in GCN_ST with no effect on the forward result.
    AR, AC, AVa = build_csr_ring_graph(N)
    offset = np.array([0, N], dtype=np.int32)   # kept for parity with the module
    a_dense = jnp.asarray(csr_to_dense(AR, AC, AVa, N))

    key = jax.random.PRNGKey(0)
    kx, k1, k2 = jax.random.split(key, 3)
    x = jax.random.normal(kx, (N, IN_SIZE), dtype=jnp.float32)
    w1 = jax.random.normal(k1, (IN_SIZE, HID_SIZE), dtype=jnp.float32)
    w2 = jax.random.normal(k2, (HID_SIZE, OUT_SIZE), dtype=jnp.float32)

    fwd = jax.jit(my_gcn_forward)
    out = jax.block_until_ready(fwd(a_dense, x, w1, w2))

    # Pure-JAX reference of the same semantics.
    hp = jax.lax.Precision.HIGHEST
    h_ref = jnp.maximum(jnp.dot(a_dense, jnp.dot(x, w1, precision=hp),
                                precision=hp), 0.0)
    z_ref = jnp.dot(a_dense, jnp.dot(h_ref, w2, precision=hp), precision=hp)
    ref = jax.nn.log_softmax(z_ref, axis=1)
    np.testing.assert_allclose(np.asarray(out), np.asarray(ref),
                               rtol=2e-4, atol=2e-4)

    print("KERNEL_OK")
</pallas_src>

<mosaic_0001>
module attributes {stable_mosaic.version = 11 : i64} {
  func.func @_fused_gcn_kernel(%arg0: i32, %arg1: memref<256x256xf32, #tpu.memory_space<vmem>>, %arg2: memref<256x32xf32, #tpu.memory_space<vmem>>, %arg3: memref<32x32xf32, #tpu.memory_space<vmem>>, %arg4: memref<32x16xf32, #tpu.memory_space<vmem>>, %arg5: memref<256x16xf32, #tpu.memory_space<vmem>>) attributes {dimension_semantics = [#tpu.dimension_semantics<arbitrary>], iteration_bounds = array<i64: 1>, scalar_prefetch = 0 : i64, scratch_operands = 0 : i64, tpu.core_type = #tpu.core_type<tc>, window_params = [{pipeline_mode = #tpu.pipeline_mode<synchronous>, transform_indices = @transform_0, window_bounds = array<i64: 256, 256>}, {pipeline_mode = #tpu.pipeline_mode<synchronous>, transform_indices = @transform_1, window_bounds = array<i64: 256, 32>}, {pipeline_mode = #tpu.pipeline_mode<synchronous>, transform_indices = @transform_2, window_bounds = array<i64: 32, 32>}, {pipeline_mode = #tpu.pipeline_mode<synchronous>, transform_indices = @transform_3, window_bounds = array<i64: 32, 16>}, {pipeline_mode = #tpu.pipeline_mode<synchronous>, transform_indices = @transform_4, window_bounds = array<i64: 256, 16>}]} {
    %c0 = arith.constant 0 : index
    %c0_0 = arith.constant 0 : index
    %0 = vector.load %arg1[%c0, %c0_0] : memref<256x256xf32, #tpu.memory_space<vmem>>, vector<256x256xf32>
    %c0_1 = arith.constant 0 : index
    %c0_2 = arith.constant 0 : index
    %1 = vector.load %arg2[%c0_1, %c0_2] : memref<256x32xf32, #tpu.memory_space<vmem>>, vector<256x32xf32>
    %c0_3 = arith.constant 0 : index
    %c0_4 = arith.constant 0 : index
    %2 = vector.load %arg3[%c0_3, %c0_4] : memref<32x32xf32, #tpu.memory_space<vmem>>, vector<32x32xf32>
    %cst = arith.constant dense<0.000000e+00> : vector<256x32xf32>
    %3 = tpu.matmul %1, %2, %cst {dimension_numbers = #tpu.dot_dimension_numbers<[1], [0], [0], [1], [0, 0, 1, 1], [], []>} : vector<256x32xf32>, vector<32x32xf32>, vector<256x32xf32> -> vector<256x32xf32>
    %cst_5 = arith.constant dense<0.000000e+00> : vector<256x32xf32>
    %4 = tpu.matmul %0, %3, %cst_5 {dimension_numbers = #tpu.dot_dimension_numbers<[1], [0], [0], [1], [0, 0, 1, 1], [], []>} : vector<256x256xf32>, vector<256x32xf32>, vector<256x32xf32> -> vector<256x32xf32>
    %cst_6 = arith.constant 0.000000e+00 : f32
    %5 = vector.broadcast %cst_6 : f32 to vector<256x32xf32>
    %6 = arith.maximumf %4, %5 : vector<256x32xf32>
    %c0_7 = arith.constant 0 : index
    %c0_8 = arith.constant 0 : index
    %7 = vector.load %arg4[%c0_7, %c0_8] : memref<32x16xf32, #tpu.memory_space<vmem>>, vector<32x16xf32>
    %cst_9 = arith.constant dense<0.000000e+00> : vector<256x16xf32>
    %8 = tpu.matmul %6, %7, %cst_9 {dimension_numbers = #tpu.dot_dimension_numbers<[1], [0], [0], [1], [0, 0, 1, 1], [], []>} : vector<256x32xf32>, vector<32x16xf32>, vector<256x16xf32> -> vector<256x16xf32>
    %cst_10 = arith.constant dense<0.000000e+00> : vector<256x16xf32>
    %9 = tpu.matmul %0, %8, %cst_10 {dimension_numbers = #tpu.dot_dimension_numbers<[1], [0], [0], [1], [0, 0, 1, 1], [], []>} : vector<256x256xf32>, vector<256x16xf32>, vector<256x16xf32> -> vector<256x16xf32>
    %cst_11 = arith.constant dense<0xFF800000> : vector<256xf32>
    %10 = vector.multi_reduction <maximumf>, %9, %cst_11 [1] : vector<256x16xf32> to vector<256xf32>
    %11 = vector.shape_cast %10 : vector<256xf32> to vector<256x1xf32>
    %12 = vector.broadcast %11 : vector<256x1xf32> to vector<256x16xf32>
    %13 = arith.subf %9, %12 : vector<256x16xf32>
    %14 = math.exp %13 : vector<256x16xf32>
    %cst_12 = arith.constant dense<0.000000e+00> : vector<256xf32>
    %15 = vector.multi_reduction <add>, %14, %cst_12 [1] : vector<256x16xf32> to vector<256xf32>
    %16 = vector.shape_cast %15 : vector<256xf32> to vector<256x1xf32>
    %17 = math.log %16 : vector<256x1xf32>
    %18 = vector.broadcast %17 : vector<256x1xf32> to vector<256x16xf32>
    %19 = arith.subf %13, %18 : vector<256x16xf32>
    %c0_13 = arith.constant 0 : index
    %c0_14 = arith.constant 0 : index
    %20 = vector.load %arg5[%c0_13, %c0_14] : memref<256x16xf32, #tpu.memory_space<vmem>>, vector<256x16xf32>
    tpu.vector_store %arg5[%c0_13, %c0_14], %19 {strides = array<i32>} : memref<256x16xf32, #tpu.memory_space<vmem>>, vector<256x16xf32>,
    return
  }
  func.func @transform_0(%arg0: i32) -> (i32, i32) {
    %c0_i32 = arith.constant 0 : i32
    %c0_i32_0 = arith.constant 0 : i32
    %c0_i32_1 = arith.constant 0 : i32
    return %c0_i32, %c0_i32_0 : i32, i32
  }
  func.func @transform_1(%arg0: i32) -> (i32, i32) {
    %c0_i32 = arith.constant 0 : i32
    %c0_i32_0 = arith.constant 0 : i32
    %c0_i32_1 = arith.constant 0 : i32
    return %c0_i32, %c0_i32_0 : i32, i32
  }
  func.func @transform_2(%arg0: i32) -> (i32, i32) {
    %c0_i32 = arith.constant 0 : i32
    %c0_i32_0 = arith.constant 0 : i32
    %c0_i32_1 = arith.constant 0 : i32
    return %c0_i32, %c0_i32_0 : i32, i32
  }
  func.func @transform_3(%arg0: i32) -> (i32, i32) {
    %c0_i32 = arith.constant 0 : i32
    %c0_i32_0 = arith.constant 0 : i32
    %c0_i32_1 = arith.constant 0 : i32
    return %c0_i32, %c0_i32_0 : i32, i32
  }
  func.func @transform_4(%arg0: i32) -> (i32, i32) {
    %c0_i32 = arith.constant 0 : i32
    %c0_i32_0 = arith.constant 0 : i32
    %c0_i32_1 = arith.constant 0 : i32
    return %c0_i32, %c0_i32_0 : i32, i32
  }
}

</mosaic_0001>

<bundles_post_ra>
// kernel: my_gcn_forward.1
= control target key start
LH: loop header
LB: loop body
LE: loop exit
PB: predicated region body
PF: predicated region fallthrough
CT: control target
= control target key end

     0   :  { %9 = vsyncpa [#allocation3], 0  ;;  %s2198_s15 = smov [#allocation2]   ;;  %s3159_s0 = inlined_call_operand.hbm [shape: f32[256,256], index: 0, kind: input, shape index: {}]   ;;  %s3160_s1 = inlined_call_operand.vmem [shape: f32[256,32], index: 1, kind: input, shape index: {}]   ;;  %s3161_s2 = inlined_call_operand.vmem [shape: f32[32,32], index: 2, kind: input, shape index: {}]   ;;  %s3162_s3 = inlined_call_operand.vmem [shape: f32[32,16], index: 3, kind: input, shape index: {}]   ;;  %s3163_s4 = inlined_call_operand.vmem [shape: f32[256,16], index: 4, kind: output, shape index: {}]  }
   0x1   :  { %s15_s16 = sshll.u32 %s2198_s15, 4  ;;  %s2174_s19 = scalar_lea.hbm %s3159_s0, 8192  ;;  %s16_s16 = int_to_ptr.vmem [resolvable:$true] %s15_s16 }
   0x2   :  { %p2175_p0 = scmp.ne.s32.totalorder %s3159_s0, %s2174_s19  ;;  %p2178_p1 = scmp.lt.u32.totalorder %s2174_s19, %s3159_s0 }
   0x4   :  { %p2180_p2 = pnand %p2178_p1, %p2175_p0 }
   0x6   :  { %2183 = shalt.err (!%p2180_p2)
}
   0x7   :  { %s2184_s24 = scalar_lea.vmem %s16_s16, 8192  ;;  %p2189_p4 = scmp.lt.s32.totalorder %s16_s16, %s16_s16 }
   0x8   :  { %p2185_p3 = scmp.ne.s32.totalorder %s16_s16, %s2184_s24  ;;  %p2190_p5 = scmp.lt.s32.totalorder %s2184_s24, %s2184_s24 }
   0xa   :  { %p2191_p6 = por %p2190_p5, %p2189_p4 }
   0xc   :  { %p2192_p7 = pnand %p2191_p6, %p2185_p3 }
   0xe   :  { %2195 = shalt.err (!%p2192_p7)
}
   0xf   :  { %s2199_s25 = smov 256   ;;  %s2200_s26 = smov 16  }
  0x10   :  { %21 = dma.hbm_to_vmem [thread:$0]  %s3159_s0, 8192, %s16_s16, [#allocation3], %s2199_s25, %s2199_s25, %s2200_s26  }
  0x11   :  { %2196 = dma.done.wait [#allocation3], 8192  }
  0x12   :  { %2197 = vsyncadd [#allocation3], 4294959104  ;;  %vm131_vm0 = vcmask 261120   ;;  %v127_v0 = vld [vmem:[%s3161_s2] sm:$0xff]  ;;  %v128_v1 = vld [vmem:[%s3161_s2 + $0x8] sm:$0xff]  ;;  %v3164_v38 = vmov 0.0|0.0  }
  0x13   :  { %v129_v2 = vld [vmem:[%s3161_s2 + $0x10] sm:$0xff]  ;;  %v1930_v3 = vpack.c.bf16 %v128_v1, %v127_v0  ;;  %v130_v4 = vld [vmem:[%s3161_s2 + $0x18] sm:$0xff]  ;;  %v95_v5 = vld [vmem:[%s3160_s1] sm:$0xff]  ;;  %vm1260_vm1 = vcmask 130048  }
  0x14   :  { %v1934_v6 = vpack.c.bf16 %v130_v4, %v129_v2  ;;  %1826 = vmatprep.mubr.msk.f32.mxu1 %vm131_vm0, %v95_v5  ;;  %v96_v7 = vld [vmem:[%s3160_s1 + $0x8] sm:$0xff]  ;;  %v97_v8 = vld [vmem:[%s3160_s1 + $0x10] sm:$0xff]  ;;  %v98_v9 = vld [vmem:[%s3160_s1 + $0x18] sm:$0xff] }
  0x15   :  { %1931 = vmatprep.subr.bf16.mxu1 %v1930_v3  ;;  %v99_v10 = vld [vmem:[%s3160_s1 + $0x20] sm:$0xff]  ;;  %v100_v11 = vld [vmem:[%s3160_s1 + $0x28] sm:$0xff]  ;;  %v101_v12 = vld [vmem:[%s3160_s1 + $0x30] sm:$0xff] }
  0x16   :  { %1933 = vmatpush3.bf16.msra.mxu1 %v1930_v3  ;;  %v102_v13 = vld [vmem:[%s3160_s1 + $0x38] sm:$0xff]  ;;  %v103_v14 = vld [vmem:[%s3160_s1 + $0x40] sm:$0xff]  ;;  %v104_v15 = vld [vmem:[%s3160_s1 + $0x48] sm:$0xff] }
  0x17   :  { %1935 = vmatprep.subr.bf16.mxu1 %v1934_v6  ;;  %v105_v16 = vld [vmem:[%s3160_s1 + $0x50] sm:$0xff]  ;;  %v106_v17 = vld [vmem:[%s3160_s1 + $0x58] sm:$0xff]  ;;  %v107_v18 = vld [vmem:[%s3160_s1 + $0x60] sm:$0xff] }
  0x18   :  { %v108_v19 = vld [vmem:[%s3160_s1 + $0x68] sm:$0xff]  ;;  %v109_v20 = vld [vmem:[%s3160_s1 + $0x70] sm:$0xff]  ;;  %v110_v21 = vld [vmem:[%s3160_s1 + $0x78] sm:$0xff] }
  0x19   :  { %v111_v22 = vld [vmem:[%s3160_s1 + $0x80] sm:$0xff]  ;;  %v112_v23 = vld [vmem:[%s3160_s1 + $0x88] sm:$0xff]  ;;  %v113_v24 = vld [vmem:[%s3160_s1 + $0x90] sm:$0xff] }
  0x1a   :  { %1937 = vmatpush3.bf16.msra.mxu1 %v1934_v6  ;;  %v114_v25 = vld [vmem:[%s3160_s1 + $0x98] sm:$0xff]  ;;  %v115_v26 = vld [vmem:[%s3160_s1 + $0xa0] sm:$0xff]  ;;  %v116_v27 = vld [vmem:[%s3160_s1 + $0xa8] sm:$0xff] }
  0x1b   :  { %v117_v28 = vld [vmem:[%s3160_s1 + $0xb0] sm:$0xff]  ;;  %v118_v29 = vld [vmem:[%s3160_s1 + $0xb8] sm:$0xff]  ;;  %v119_v30 = vld [vmem:[%s3160_s1 + $0xc0] sm:$0xff]  ;;  %1938 = vmatprep.subr.bf16.mxu1 %v3164_v38 }
  0x1c   :  { %v120_v31 = vld [vmem:[%s3160_s1 + $0xc8] sm:$0xff]  ;;  %v121_v32 = vld [vmem:[%s3160_s1 + $0xd0] sm:$0xff]  ;;  %v122_v33 = vld [vmem:[%s3160_s1 + $0xd8] sm:$0xff] }
  0x1d   :  { %1827 = vmatmul.mubr.msk.f32.vlgmr.msra.gmra.mrb[0].mxu1 %vm131_vm0, %v96_v7  ;;  %v123_v34 = vld [vmem:[%s3160_s1 + $0xe0] sm:$0xff]  ;;  %v124_v35 = vld [vmem:[%s3160_s1 + $0xe8] sm:$0xff]  ;;  %v125_v36 = vld [vmem:[%s3160_s1 + $0xf0] sm:$0xff] }
  0x1e   :  { %1829 = vmatprep.mubr.msk.f32.mxu1 %vm131_vm0, %v97_v8  ;;  %v126_v37 = vld [vmem:[%s3160_s1 + $0xf8] sm:$0xff]  ;;  %v2380_v39 = vld [vmem:[#allocation2 + $0x8] sm:$0xff] }
  0x21   :  { %1830 = vmatmul.mubr.msk.f32.gmra.mrb[2].mxu1 %vm131_vm0, %v98_v9 }
  0x22   :  { %1832 = vmatprep.mubr.msk.f32.mxu1 %vm131_vm0, %v99_v10 }
  0x25   :  { %1833 = vmatmul.mubr.msk.f32.gmra.mrb[4].mxu1 %vm131_vm0, %v100_v11 }
  0x26   :  { %1835 = vmatprep.mubr.msk.f32.mxu1 %vm131_vm0, %v101_v12 }
  0x29   :  { %1836 = vmatmul.mubr.msk.f32.gmra.mrb[6].mxu1 %vm131_vm0, %v102_v13 }
  0x2a   :  { %1838 = vmatprep.mubr.msk.f32.mxu1 %vm131_vm0, %v103_v14 }
  0x2d   :  { %1839 = vmatmul.mubr.msk.f32.gmra.mrb[8].mxu1 %vm131_vm0, %v104_v15 }
  0x2e   :  { %1841 = vmatprep.mubr.msk.f32.mxu1 %vm131_vm0, %v105_v16 }
  0x31   :  { %1842 = vmatmul.mubr.msk.f32.gmra.mrb[10].mxu1 %vm131_vm0, %v106_v17 }
  0x32   :  { %1844 = vmatprep.mubr.msk.f32.mxu1 %vm131_vm0, %v107_v18 }
  0x35   :  { %1845 = vmatmul.mubr.msk.f32.gmra.mrb[12].mxu1 %vm131_vm0, %v108_v19 }
  0x36   :  { %1847 = vmatprep.mubr.msk.f32.mxu1 %vm131_vm0, %v109_v20 }
  0x39   :  { %1848 = vmatmul.mubr.msk.f32.gmra.mrb[14].mxu1 %vm131_vm0, %v110_v21 }
  0x3a   :  { %1850 = vmatprep.mubr.msk.f32.mxu1 %vm131_vm0, %v111_v22 }
  0x3d   :  { %1851 = vmatmul.mubr.msk.f32.gmra.mrb[16].mxu1 %vm131_vm0, %v112_v23 }
  0x3e   :  { %1853 = vmatprep.mubr.msk.f32.mxu1 %vm131_vm0, %v113_v24  ;;  %v710_v24 = vld [vmem:[%s3162_s3] sm:$0xff] }
  0x41   :  { %1854 = vmatmul.mubr.msk.f32.gmra.mrb[18].mxu1 %vm131_vm0, %v114_v25  ;;  %v711_v25 = vld [vmem:[%s3162_s3 + $0x8] sm:$0xff] }
  0x42   :  { %1856 = vmatprep.mubr.msk.f32.mxu1 %vm131_vm0, %v115_v26  ;;  %v2404_v26 = vld [vmem:[#allocation2] sm:$0xff] }
  0x45   :  { %1857 = vmatmul.mubr.msk.f32.gmra.mrb[20].mxu1 %vm131_vm0, %v116_v27  ;;  %v1986_v27 = vpack.c.bf16 %v711_v25, %v710_v24  ;;  %v2579_v24 = vld [vmem:[#allocation2 + $0x1c0] sm:$0xff]  ;;  %v2581_v25 = vld [vmem:[#allocation2 + $0x1d8] sm:$0xff] }
  0x46   :  { %1859 = vmatprep.mubr.msk.f32.mxu1 %vm131_vm0, %v117_v28  ;;  %v2406_v28 = vld [vmem:[#allocation2 + $0x18] sm:$0xff]  ;;  %3185 = vst [vmem:[#allocation11_spill] sm:$0xff] %v2579_v24  ;;  %3186 = vst [vmem:[#allocation12_spill] sm:$0xff] %v2581_v25 }
  0x47   :  { %1987 = vmatprep.subr.bf16.mxu0 %v1986_v27 }
  0x48   :  { %1989 = vmatpush3.bf16.msra.mxu0 %v1986_v27  ;;  %v2585_v27 = vld [vmem:[#allocation2 + $0x1d0] sm:$0xff] }
  0x49   :  { %1860 = vmatmul.mubr.msk.f32.gmra.mrb[22].mxu1 %vm131_vm0, %v118_v29  ;;  %v2410_v29 = vld [vmem:[#allocation2 + $0x10] sm:$0xff]  ;;  %3187 = vst [vmem:[#allocation13_spill] sm:$0xff] %v2585_v27 }
  0x4a   :  { %1862 = vmatprep.mubr.msk.f32.mxu1 %vm131_vm0, %v119_v30  ;;  %v2412_v30 = vld [vmem:[#allocation2 + $0x28] sm:$0xff] }
  0x4d   :  { %1863 = vmatmul.mubr.msk.f32.gmra.mrb[24].mxu1 %vm131_vm0, %v120_v31  ;;  %v2416_v31 = vld [vmem:[#allocation2 + $0x20] sm:$0xff] }
  0x4e   :  { %1865 = vmatprep.mubr.msk.f32.mxu1 %vm131_vm0, %v121_v32  ;;  %v2418_v32 = vld [vmem:[#allocation2 + $0x38] sm:$0xff] }
  0x51   :  { %1866 = vmatmul.mubr.msk.f32.gmra.mrb[26].mxu1 %vm131_vm0, %v122_v33  ;;  %v2422_v33 = vld [vmem:[#allocation2 + $0x30] sm:$0xff] }
  0x52   :  { %1868 = vmatprep.mubr.msk.f32.mxu1 %vm131_vm0, %v123_v34  ;;  %v2424_v34 = vld [vmem:[#allocation2 + $0x48] sm:$0xff] }
  0x55   :  { %1869 = vmatmul.mubr.msk.f32.gmra.mrb[28].mxu1 %vm131_vm0, %v124_v35  ;;  %v2428_v35 = vld [vmem:[#allocation2 + $0x40] sm:$0xff] }
  0x56   :  { %1871 = vmatprep.mubr.msk.f32.mxu1 %vm131_vm0, %v125_v36  ;;  %v2430_v36 = vld [vmem:[#allocation2 + $0x58] sm:$0xff] }
  0x59   :  { %1872 = vmatmul.mubr.msk.f32.gmra.mrb[30].mxu1 %vm131_vm0, %v126_v37  ;;  %v2434_v37 = vld [vmem:[#allocation2 + $0x50] sm:$0xff] }
  0x5a   :  { %517 = vmatprep.mubr.f32.mxu1 %v2380_v39 }
  0xf0   :  { %v1828_v40 = vpop.f32.mrb[0].mxu1 }
  0xf1   :  { %v294_v41 = vpop.f32.mrb[1].mxu1 }
  0xf2   :  { %v1939_v42 = vpack.c.bf16 %v1828_v40, %v294_v41  ;;  %v2436_v40 = vld [vmem:[#allocation2 + $0x68] sm:$0xff]  ;;  %v2440_v41 = vld [vmem:[#allocation2 + $0x60] sm:$0xff] }
  0xf4   :  { %v1831_v43 = vpop.f32.mrb[2].mxu1  ;;  %1940 = vmatpush1.bf16.msra.mxu1 %v1939_v42  ;;  %v2442_v42 = vld [vmem:[#allocation2 + $0x78] sm:$0xff] }
  0xf5   :  { %v304_v44 = vpop.f32.mrb[3].mxu1  ;;  %1941 = vmatprep.subr.bf16.mxu1 %v3164_v38 }
  0xf6   :  { %v1942_v45 = vpack.c.bf16 %v1831_v43, %v304_v44  ;;  %v2446_v43 = vld [vmem:[#allocation2 + $0x70] sm:$0xff]  ;;  %v2448_v44 = vld [vmem:[#allocation2 + $0x88] sm:$0xff] }
  0xf8   :  { %v1834_v46 = vpop.f32.mrb[4].mxu1  ;;  %1943 = vmatpush1.bf16.msra.mxu1 %v1942_v45  ;;  %v2452_v45 = vld [vmem:[#allocation2 + $0x80] sm:$0xff] }
  0xf9   :  { %v314_v47 = vpop.f32.mrb[5].mxu1  ;;  %1944 = vmatprep.subr.bf16.mxu1 %v3164_v38 }
  0xfa   :  { %v1945_v48 = vpack.c.bf16 %v1834_v46, %v314_v47  ;;  %v2454_v46 = vld [vmem:[#allocation2 + $0x98] sm:$0xff]  ;;  %v2458_v47 = vld [vmem:[#allocation2 + $0x90] sm:$0xff] }
  0xfc   :  { %v1837_v49 = vpop.f32.mrb[6].mxu1  ;;  %1946 = vmatpush1.bf16.msra.mxu1 %v1945_v48  ;;  %v2460_v48 = vld [vmem:[#allocation2 + $0xa8] sm:$0xff] }
  0xfd   :  { %v324_v50 = vpop.f32.mrb[7].mxu1  ;;  %1947 = vmatprep.subr.bf16.mxu1 %v3164_v38 }
  0xfe   :  { %v1948_v51 = vpack.c.bf16 %v1837_v49, %v324_v50  ;;  %v2464_v49 = vld [vmem:[#allocation2 + $0xa0] sm:$0xff]  ;;  %v2466_v50 = vld [vmem:[#allocation2 + $0xb8] sm:$0xff] }
 0x100   :  { %v1840_v52 = vpop.f32.mrb[8].mxu1  ;;  %1949 = vmatpush1.bf16.msra.mxu1 %v1948_v51  ;;  %v2470_v51 = vld [vmem:[#allocation2 + $0xb0] sm:$0xff] }
 0x101   :  { %v334_v53 = vpop.f32.mrb[9].mxu1  ;;  %1950 = vmatprep.subr.bf16.mxu1 %v3164_v38 }
 0x102   :  { %v1951_v54 = vpack.c.bf16 %v1840_v52, %v334_v53  ;;  %v2472_v52 = vld [vmem:[#allocation2 + $0xc8] sm:$0xff]  ;;  %v2476_v53 = vld [vmem:[#allocation2 + $0xc0] sm:$0xff] }
 0x104   :  { %v1843_v55 = vpop.f32.mrb[10].mxu1  ;;  %1952 = vmatpush1.bf16.msra.mxu1 %v1951_v54  ;;  %v2478_v54 = vld [vmem:[#allocation2 + $0xd8] sm:$0xff] }
 0x105   :  { %v344_v56 = vpop.f32.mrb[11].mxu1  ;;  %1953 = vmatprep.subr.bf16.mxu1 %v3164_v38 }
 0x106   :  { %v1954_v57 = vpack.c.bf16 %v1843_v55, %v344_v56  ;;  %v2482_v55 = vld [vmem:[#allocation2 + $0xd0] sm:$0xff]  ;;  %v2484_v56 = vld [vmem:[#allocation2 + $0xe8] sm:$0xff] }
 0x108   :  { %v1846_v58 = vpop.f32.mrb[12].mxu1  ;;  %1955 = vmatpush1.bf16.msra.mxu1 %v1954_v57  ;;  %v2488_v57 = vld [vmem:[#allocation2 + $0xe0] sm:$0xff] }
 0x109   :  { %v354_v59 = vpop.f32.mrb[13].mxu1  ;;  %1956 = vmatprep.subr.bf16.mxu1 %v3164_v38 }
 0x10a   :  { %v1957_v60 = vpack.c.bf16 %v1846_v58, %v354_v59  ;;  %v2490_v58 = vld [vmem:[#allocation2 + $0xf8] sm:$0xff]  ;;  %v2494_v59 = vld [vmem:[#allocation2 + $0xf0] sm:$0xff] }
 0x10c   :  { %v1849_v61 = vpop.f32.mrb[14].mxu1  ;;  %1958 = vmatpush1.bf16.msra.mxu1 %v1957_v60  ;;  %v2496_v60 = vld [vmem:[#allocation2 + $0x108] sm:$0xff] }
 0x10d   :  { %v364_v62 = vpop.f32.mrb[15].mxu1  ;;  %1959 = vmatprep.subr.bf16.mxu1 %v3164_v38 }
 0x10e   :  { %v1960_v63 = vpack.c.bf16 %v1849_v61, %v364_v62  ;;  %v2500_v61 = vld [vmem:[#allocation2 + $0x100] sm:$0xff]  ;;  %v2502_v62 = vld [vmem:[#allocation2 + $0x118] sm:$0xff] }
 0x110   :  { %v1852_v0 = vpop.f32.mrb[16].mxu1  ;;  %1961 = vmatpush1.bf16.msra.mxu1 %v1960_v63  ;;  %v2506_v63 = vld [vmem:[#allocation2 + $0x110] sm:$0xff] }
 0x111   :  { %v374_v1 = vpop.f32.mrb[17].mxu1  ;;  %1962 = vmatprep.subr.bf16.mxu1 %v3164_v38 }
 0x112   :  { %v1963_v2 = vpack.c.bf16 %v1852_v0, %v374_v1  ;;  %v2508_v0 = vld [vmem:[#allocation2 + $0x128] sm:$0xff]  ;;  %v2512_v1 = vld [vmem:[#allocation2 + $0x120] sm:$0xff] }
 0x114   :  { %v1855_v3 = vpop.f32.mrb[18].mxu1  ;;  %1964 = vmatpush1.bf16.msra.mxu1 %v1963_v2  ;;  %v2514_v2 = vld [vmem:[#allocation2 + $0x138] sm:$0xff] }
 0x115   :  { %v384_v4 = vpop.f32.mrb[19].mxu1  ;;  %1965 = vmatprep.subr.bf16.mxu1 %v3164_v38 }
 0x116   :  { %v1966_v5 = vpack.c.bf16 %v1855_v3, %v384_v4  ;;  %v2518_v3 = vld [vmem:[#allocation2 + $0x130] sm:$0xff]  ;;  %v2520_v4 = vld [vmem:[#allocation2 + $0x148] sm:$0xff] }
 0x118   :  { %v1858_v6 = vpop.f32.mrb[20].mxu1  ;;  %1967 = vmatpush1.bf16.msra.mxu1 %v1966_v5  ;;  %v2524_v5 = vld [vmem:[#allocation2 + $0x140] sm:$0xff] }
 0x119   :  { %v394_v7 = vpop.f32.mrb[21].mxu1  ;;  %1968 = vmatprep.subr.bf16.mxu1 %v3164_v38 }
 0x11a   :  { %v1969_v8 = vpack.c.bf16 %v1858_v6, %v394_v7  ;;  %v2526_v6 = vld [vmem:[#allocation2 + $0x158] sm:$0xff]  ;;  %v2530_v7 = vld [vmem:[#allocation2 + $0x150] sm:$0xff] }
 0x11c   :  { %v1861_v9 = vpop.f32.mrb[22].mxu1  ;;  %1970 = vmatpush1.bf16.msra.mxu1 %v1969_v8  ;;  %v2532_v8 = vld [vmem:[#allocation2 + $0x168] sm:$0xff] }
 0x11d   :  { %v404_v10 = vpop.f32.mrb[23].mxu1  ;;  %1971 = vmatprep.subr.bf16.mxu1 %v3164_v38 }
 0x11e   :  { %v1972_v11 = vpack.c.bf16 %v1861_v9, %v404_v10  ;;  %v712_v9 = vld [vmem:[%s3162_s3 + $0x10] sm:$0xff]  ;;  %v713_v10 = vld [vmem:[%s3162_s3 + $0x18] sm:$0xff] }
 0x120   :  { %v1864_v12 = vpop.f32.mrb[24].mxu1  ;;  %1973 = vmatpush1.bf16.msra.mxu1 %v1972_v11  ;;  %v1990_v11 = vpack.c.bf16 %v713_v10, %v712_v9  ;;  %v2587_v9 = vld [vmem:[#allocation2 + $0x1e8] sm:$0xff]  ;;  %v2591_v10 = vld [vmem:[#allocation2 + $0x1e0] sm:$0xff] }
 0x121   :  { %v414_v13 = vpop.f32.mrb[25].mxu1  ;;  %1974 = vmatprep.subr.bf16.mxu1 %v3164_v38  ;;  %3188 = vst [vmem:[#allocation14_spill] sm:$0xff] %v2587_v9  ;;  %3189 = vst [vmem:[#allocation15_spill] sm:$0xff] %v2591_v10 }
 0x122   :  { %v1975_v14 = vpack.c.bf16 %v1864_v12, %v414_v13  ;;  %v2542_v12 = vld [vmem:[#allocation2 + $0x160] sm:$0xff]  ;;  %v2544_v13 = vld [vmem:[#allocation2 + $0x178] sm:$0xff]  ;;  %1991 = vmatprep.subr.bf16.mxu0 %v1990_v11 }
 0x123   :  { %1993 = vmatpush3.bf16.msra.mxu0 %v1990_v11  ;;  %v2593_v11 = vld [vmem:[#allocation2 + $0x1f8] sm:$0xff] }
 0x124   :  { %v1867_v15 = vpop.f32.mrb[26].mxu1  ;;  %1976 = vmatpush1.bf16.msra.mxu1 %v1975_v14  ;;  %1994 = vmatprep.subr.bf16.mxu0 %v3164_v38  ;;  %v2549_v14 = vld [vmem:[#allocation2 + $0x170] sm:$0xff]  ;;  %3190 = vst [vmem:[#allocation16_spill] sm:$0xff] %v2593_v11 }
 0x125   :  { %v424_v16 = vpop.f32.mrb[27].mxu1  ;;  %1977 = vmatprep.subr.bf16.mxu1 %v3164_v38 }
 0x126   :  { %v1978_v17 = vpack.c.bf16 %v1867_v15, %v424_v16  ;;  %v2551_v15 = vld [vmem:[#allocation2 + $0x188] sm:$0xff]  ;;  %v2555_v16 = vld [vmem:[#allocation2 + $0x180] sm:$0xff] }
 0x128   :  { %v1870_v18 = vpop.f32.mrb[28].mxu1  ;;  %1979 = vmatpush1.bf16.msra.mxu1 %v1978_v17  ;;  %v2557_v17 = vld [vmem:[#allocation2 + $0x198] sm:$0xff] }
 0x129   :  { %v434_v19 = vpop.f32.mrb[29].mxu1  ;;  %1980 = vmatprep.subr.bf16.mxu1 %v3164_v38 }
 0x12a   :  { %v1981_v20 = vpack.c.bf16 %v1870_v18, %v434_v19  ;;  %v2561_v18 = vld [vmem:[#allocation2 + $0x190] sm:$0xff]  ;;  %v2563_v19 = vld [vmem:[#allocation2 + $0x1a8] sm:$0xff] }
 0x12b   :  { %3179 = vst [vmem:[#allocation5_spill] sm:$0xff] %v2561_v18  ;;  %3180 = vst [vmem:[#allocation6_spill] sm:$0xff] %v2563_v19 }
 0x12c   :  { %v1873_v21 = vpop.f32.mrb[30].mxu1  ;;  %1982 = vmatpush1.bf16.msra.mxu1 %v1981_v20  ;;  %v2567_v20 = vld [vmem:[#allocation2 + $0x1a0] sm:$0xff] }
 0x12d   :  { %v444_v22 = vpop.f32.mrb[31].mxu1  ;;  %1983 = vmatprep.subr.bf16.mxu1 %v3164_v38  ;;  %3181 = vst [vmem:[#allocation7_spill] sm:$0xff] %v2567_v20  ;;  %v2597_v38 = vld [vmem:[#allocation2 + $0x1f0] sm:$0xff] }
 0x12e   :  { %v1984_v23 = vpack.c.bf16 %v1873_v21, %v444_v22  ;;  %v2569_v21 = vld [vmem:[#allocation2 + $0x1b8] sm:$0xff]  ;;  %v2573_v22 = vld [vmem:[#allocation2 + $0x1b0] sm:$0xff]  ;;  %3191 = vst [vmem:[#allocation17_spill] sm:$0xff] %v2597_v38 }
 0x12f   :  { %3182 = vst [vmem:[#allocation8_spill] sm:$0xff] %v2569_v21  ;;  %3183 = vst [vmem:[#allocation9_spill] sm:$0xff] %v2573_v22 }
 0x130   :  { %1985 = vmatpush1.bf16.msra.mxu1 %v1984_v23  ;;  %v2575_v23 = vld [vmem:[#allocation2 + $0x1c8] sm:$0xff] }
 0x131   :  { %3184 = vst [vmem:[#allocation10_spill] sm:$0xff] %v2575_v23 }
 0x133   :  { %518 = vmatmul.mubr.f32.vlgmr.msra.gmra.mrb[32].mxu1 %v2404_v26 }
 0x134   :  { %522 = vmatprep.mubr.f32.mxu1 %v2406_v28 }
 0x137   :  { %523 = vmatmul.mubr.f32.gmra.mrb[34].mxu1 %v2410_v29 }
 0x138   :  { %527 = vmatprep.mubr.f32.mxu1 %v2412_v30 }
 0x13b   :  { %528 = vmatmul.mubr.f32.gmra.mrb[36].mxu1 %v2416_v31 }
 0x13c   :  { %532 = vmatprep.mubr.f32.mxu1 %v2418_v32 }
 0x13f   :  { %533 = vmatmul.mubr.f32.gmra.mrb[38].mxu1 %v2422_v33 }
 0x140   :  { %537 = vmatprep.mubr.f32.mxu1 %v2424_v34 }
 0x143   :  { %538 = vmatmul.mubr.f32.gmra.mrb[40].mxu1 %v2428_v35 }
 0x144   :  { %542 = vmatprep.mubr.f32.mxu1 %v2430_v36 }
 0x147   :  { %543 = vmatmul.mubr.f32.gmra.mrb[42].mxu1 %v2434_v37 }
 0x148   :  { %547 = vmatprep.mubr.f32.mxu1 %v2436_v40 }
 0x14b   :  { %548 = vmatmul.mubr.f32.gmra.mrb[44].mxu1 %v2440_v41 }
 0x14c   :  { %552 = vmatprep.mubr.f32.mxu1 %v2442_v42 }
 0x14f   :  { %553 = vmatmul.mubr.f32.gmra.mrb[46].mxu1 %v2446_v43 }
 0x150   :  { %557 = vmatprep.mubr.f32.mxu1 %v2448_v44 }
 0x153   :  { %558 = vmatmul.mubr.f32.gmra.mrb[48].mxu1 %v2452_v45 }
 0x154   :  { %562 = vmatprep.mubr.f32.mxu1 %v2454_v46 }
 0x157   :  { %563 = vmatmul.mubr.f32.gmra.mrb[50].mxu1 %v2458_v47 }
 0x158   :  { %567 = vmatprep.mubr.f32.mxu1 %v2460_v48 }
 0x15b   :  { %568 = vmatmul.mubr.f32.gmra.mrb[52].mxu1 %v2464_v49 }
 0x15c   :  { %572 = vmatprep.mubr.f32.mxu1 %v2466_v50 }
 0x15f   :  { %573 = vmatmul.mubr.f32.gmra.mrb[54].mxu1 %v2470_v51 }
 0x160   :  { %577 = vmatprep.mubr.f32.mxu1 %v2472_v52 }
 0x163   :  { %578 = vmatmul.mubr.f32.gmra.mrb[56].mxu1 %v2476_v53 }
 0x164   :  { %582 = vmatprep.mubr.f32.mxu1 %v2478_v54 }
 0x167   :  { %583 = vmatmul.mubr.f32.gmra.mrb[58].mxu1 %v2482_v55 }
 0x168   :  { %587 = vmatprep.mubr.f32.mxu1 %v2484_v56 }
 0x16b   :  { %588 = vmatmul.mubr.f32.gmra.mrb[60].mxu1 %v2488_v57 }
 0x16c   :  { %592 = vmatprep.mubr.f32.mxu1 %v2490_v58 }
 0x16f   :  { %593 = vmatmul.mubr.f32.gmra.mrb[62].mxu1 %v2494_v59 }
 0x170   :  { %597 = vmatprep.mubr.f32.mxu1 %v2496_v60 }
 0x173   :  { %598 = vmatmul.mubr.f32.gmra.mrb[64].mxu1 %v2500_v61 }
 0x174   :  { %602 = vmatprep.mubr.f32.mxu1 %v2502_v62 }
 0x177   :  { %603 = vmatmul.mubr.f32.gmra.mrb[66].mxu1 %v2506_v63 }
 0x178   :  { %607 = vmatprep.mubr.f32.mxu1 %v2508_v0 }
 0x17b   :  { %608 = vmatmul.mubr.f32.gmra.mrb[68].mxu1 %v2512_v1 }
 0x17c   :  { %612 = vmatprep.mubr.f32.mxu1 %v2514_v2 }
 0x17f   :  { %613 = vmatmul.mubr.f32.gmra.mrb[70].mxu1 %v2518_v3 }
 0x180   :  { %617 = vmatprep.mubr.f32.mxu1 %v2520_v4 }
 0x183   :  { %618 = vmatmul.mubr.f32.gmra.mrb[72].mxu1 %v2524_v5 }
 0x184   :  { %622 = vmatprep.mubr.f32.mxu1 %v2526_v6 }
 0x187   :  { %623 = vmatmul.mubr.f32.gmra.mrb[74].mxu1 %v2530_v7 }
 0x188   :  { %627 = vmatprep.mubr.f32.mxu1 %v2532_v8 }
 0x18b   :  { %628 = vmatmul.mubr.f32.gmra.mrb[76].mxu1 %v2542_v12 }
 0x18c   :  { %632 = vmatprep.mubr.f32.mxu1 %v2544_v13 }
 0x18f   :  { %633 = vmatmul.mubr.f32.gmra.mrb[78].mxu1 %v2549_v14 }
 0x190   :  { %637 = vmatprep.mubr.f32.mxu1 %v2551_v15 }
 0x193   :  { %638 = vmatmul.mubr.f32.gmra.mrb[80].mxu1 %v2555_v16 }
 0x194   :  { %642 = vmatprep.mubr.f32.mxu1 %v2557_v17 }
 0x197   :  { %643 = vmatmul.mubr.f32.gmra.mrb[82].mxu1 %v2561_v18 }
 0x198   :  { %647 = vmatprep.mubr.f32.mxu1 %v2563_v19 }
 0x19b   :  { %648 = vmatmul.mubr.f32.gmra.mrb[84].mxu1 %v2567_v20 }
 0x19c   :  { %652 = vmatprep.mubr.f32.mxu1 %v2569_v21 }
 0x19f   :  { %653 = vmatmul.mubr.f32.gmra.mrb[86].mxu1 %v2573_v22 }
 0x1a0   :  { %657 = vmatprep.mubr.f32.mxu1 %v2575_v23 }
 0x1a3   :  { %658 = vmatmul.mubr.f32.gmra.mrb[88].mxu1 %v2579_v24 }
 0x1a4   :  { %662 = vmatprep.mubr.f32.mxu1 %v2581_v25 }
 0x1a7   :  { %663 = vmatmul.mubr.f32.gmra.mrb[90].mxu1 %v2585_v27 }
 0x1a8   :  { %667 = vmatprep.mubr.f32.mxu1 %v2587_v9 }
 0x1ab   :  { %668 = vmatmul.mubr.f32.gmra.mrb[92].mxu1 %v2591_v10 }
 0x1ac   :  { %672 = vmatprep.mubr.f32.mxu1 %v2593_v11 }
 0x1af   :  { %673 = vmatmul.mubr.f32.gmra.mrb[94].mxu1 %v2597_v38 }
 0x206   :  { %v519_v25 = vpop.f32.mrb[32].mxu1 }
 0x207   :  { %v678_v24 = vmax.f32 %v519_v25, 0.0  ;;  %v521_v23 = vpop.f32.mrb[33].mxu1 }
 0x209   :  { %1882 = vmatprep.mubr.msk.f32.mxu0 %vm131_vm0, %v678_v24 }
 0x20a   :  { %v524_v27 = vpop.f32.mrb[34].mxu1 }
 0x20b   :  { %v679_v22 = vmax.f32 %v524_v27, 0.0  ;;  %v526_v9 = vpop.f32.mrb[35].mxu1 }
 0x20d   :  { %1883 = vmatmul.mubr.msk.f32.vlgmr.msra.gmra.mrb[0].mxu0 %vm131_vm0, %v679_v22 }
 0x20e   :  { %v529_v21 = vpop.f32.mrb[36].mxu1 }
 0x20f   :  { %v680_v20 = vmax.f32 %v529_v21, 0.0  ;;  %v531_v19 = vpop.f32.mrb[37].mxu1 }
 0x211   :  { %1885 = vmatprep.mubr.msk.f32.mxu0 %vm131_vm0, %v680_v20 }
 0x212   :  { %v534_v11 = vpop.f32.mrb[38].mxu1 }
 0x213   :  { %v681_v10 = vmax.f32 %v534_v11, 0.0  ;;  %v536_v18 = vpop.f32.mrb[39].mxu1 }
 0x215   :  { %1886 = vmatmul.mubr.msk.f32.gmra.mrb[2].mxu0 %vm131_vm0, %v681_v10 }
 0x216   :  { %v539_v38 = vpop.f32.mrb[40].mxu1 }
 0x217   :  { %v682_v25 = vmax.f32 %v539_v38, 0.0  ;;  %v541_v23 = vpop.f32.mrb[41].mxu1 }
 0x219   :  { %1888 = vmatprep.mubr.msk.f32.mxu0 %vm131_vm0, %v682_v25 }
 0x21a   :  { %v544_v24 = vpop.f32.mrb[42].mxu1 }
 0x21b   :  { %v683_v27 = vmax.f32 %v544_v24, 0.0  ;;  %v546_v9 = vpop.f32.mrb[43].mxu1 }
 0x21d   :  { %1889 = vmatmul.mubr.msk.f32.gmra.mrb[4].mxu0 %vm131_vm0, %v683_v27 }
 0x21e   :  { %v549_v22 = vpop.f32.mrb[44].mxu1 }
 0x21f   :  { %v684_v21 = vmax.f32 %v549_v22, 0.0  ;;  %v551_v19 = vpop.f32.mrb[45].mxu1 }
 0x221   :  { %1891 = vmatprep.mubr.msk.f32.mxu0 %vm131_vm0, %v684_v21 }
 0x222   :  { %v554_v20 = vpop.f32.mrb[46].mxu1 }
 0x223   :  { %v685_v11 = vmax.f32 %v554_v20, 0.0  ;;  %v556_v18 = vpop.f32.mrb[47].mxu1 }
 0x225   :  { %1892 = vmatmul.mubr.msk.f32.gmra.mrb[6].mxu0 %vm131_vm0, %v685_v11 }
 0x226   :  { %v559_v10 = vpop.f32.mrb[48].mxu1 }
 0x227   :  { %v686_v38 = vmax.f32 %v559_v10, 0.0  ;;  %v561_v23 = vpop.f32.mrb[49].mxu1 }
 0x229   :  { %1894 = vmatprep.mubr.msk.f32.mxu0 %vm131_vm0, %v686_v38 }
 0x22a   :  { %v564_v25 = vpop.f32.mrb[50].mxu1 }
 0x22b   :  { %v687_v24 = vmax.f32 %v564_v25, 0.0  ;;  %v566_v9 = vpop.f32.mrb[51].mxu1 }
 0x22d   :  { %1895 = vmatmul.mubr.msk.f32.gmra.mrb[8].mxu0 %vm131_vm0, %v687_v24 }
 0x22e   :  { %v569_v27 = vpop.f32.mrb[52].mxu1 }
 0x22f   :  { %v688_v22 = vmax.f32 %v569_v27, 0.0  ;;  %v571_v19 = vpop.f32.mrb[53].mxu1 }
 0x231   :  { %1897 = vmatprep.mubr.msk.f32.mxu0 %vm131_vm0, %v688_v22 }
 0x232   :  { %v574_v21 = vpop.f32.mrb[54].mxu1 }
 0x233   :  { %v689_v20 = vmax.f32 %v574_v21, 0.0  ;;  %v576_v18 = vpop.f32.mrb[55].mxu1 }
 0x235   :  { %1898 = vmatmul.mubr.msk.f32.gmra.mrb[10].mxu0 %vm131_vm0, %v689_v20 }
 0x236   :  { %v579_v11 = vpop.f32.mrb[56].mxu1 }
 0x237   :  { %v690_v10 = vmax.f32 %v579_v11, 0.0  ;;  %v581_v23 = vpop.f32.mrb[57].mxu1 }
 0x239   :  { %1900 = vmatprep.mubr.msk.f32.mxu0 %vm131_vm0, %v690_v10 }
 0x23a   :  { %v584_v38 = vpop.f32.mrb[58].mxu1 }
 0x23b   :  { %v691_v25 = vmax.f32 %v584_v38, 0.0  ;;  %v586_v9 = vpop.f32.mrb[59].mxu1 }
 0x23d   :  { %1901 = vmatmul.mubr.msk.f32.gmra.mrb[12].mxu0 %vm131_vm0, %v691_v25 }
 0x23e   :  { %v589_v24 = vpop.f32.mrb[60].mxu1 }
 0x23f   :  { %v692_v27 = vmax.f32 %v589_v24, 0.0  ;;  %v591_v19 = vpop.f32.mrb[61].mxu1 }
 0x241   :  { %1903 = vmatprep.mubr.msk.f32.mxu0 %vm131_vm0, %v692_v27 }
 0x242   :  { %v594_v22 = vpop.f32.mrb[62].mxu1 }
 0x243   :  { %v693_v21 = vmax.f32 %v594_v22, 0.0  ;;  %v596_v18 = vpop.f32.mrb[63].mxu1 }
 0x245   :  { %1904 = vmatmul.mubr.msk.f32.gmra.mrb[14].mxu0 %vm131_vm0, %v693_v21 }
 0x246   :  { %v599_v20 = vpop.f32.mrb[64].mxu1 }
 0x247   :  { %v694_v11 = vmax.f32 %v599_v20, 0.0  ;;  %v601_v23 = vpop.f32.mrb[65].mxu1 }
 0x249   :  { %1906 = vmatprep.mubr.msk.f32.mxu0 %vm131_vm0, %v694_v11 }
 0x24a   :  { %v604_v10 = vpop.f32.mrb[66].mxu1 }
 0x24b   :  { %v695_v38 = vmax.f32 %v604_v10, 0.0  ;;  %v606_v9 = vpop.f32.mrb[67].mxu1 }
 0x24d   :  { %1907 = vmatmul.mubr.msk.f32.gmra.mrb[16].mxu0 %vm131_vm0, %v695_v38 }
 0x24e   :  { %v609_v25 = vpop.f32.mrb[68].mxu1 }
 0x24f   :  { %v696_v24 = vmax.f32 %v609_v25, 0.0  ;;  %v611_v19 = vpop.f32.mrb[69].mxu1 }
 0x251   :  { %1909 = vmatprep.mubr.msk.f32.mxu0 %vm131_vm0, %v696_v24 }
 0x252   :  { %v614_v27 = vpop.f32.mrb[70].mxu1 }
 0x253   :  { %v697_v22 = vmax.f32 %v614_v27, 0.0  ;;  %v616_v18 = vpop.f32.mrb[71].mxu1 }
 0x255   :  { %1910 = vmatmul.mubr.msk.f32.gmra.mrb[18].mxu0 %vm131_vm0, %v697_v22 }
 0x256   :  { %v619_v21 = vpop.f32.mrb[72].mxu1 }
 0x257   :  { %v698_v20 = vmax.f32 %v619_v21, 0.0  ;;  %v621_v23 = vpop.f32.mrb[73].mxu1 }
 0x259   :  { %1912 = vmatprep.mubr.msk.f32.mxu0 %vm131_vm0, %v698_v20 }
 0x25a   :  { %v624_v11 = vpop.f32.mrb[74].mxu1 }
 0x25b   :  { %v699_v10 = vmax.f32 %v624_v11, 0.0  ;;  %v626_v9 = vpop.f32.mrb[75].mxu1 }
 0x25d   :  { %1913 = vmatmul.mubr.msk.f32.gmra.mrb[20].mxu0 %vm131_vm0, %v699_v10 }
 0x25e   :  { %v629_v38 = vpop.f32.mrb[76].mxu1 }
 0x25f   :  { %v700_v25 = vmax.f32 %v629_v38, 0.0  ;;  %v631_v19 = vpop.f32.mrb[77].mxu1 }
 0x261   :  { %1915 = vmatprep.mubr.msk.f32.mxu0 %vm131_vm0, %v700_v25 }
 0x262   :  { %v634_v24 = vpop.f32.mrb[78].mxu1 }
 0x263   :  { %v701_v27 = vmax.f32 %v634_v24, 0.0  ;;  %v636_v18 = vpop.f32.mrb[79].mxu1 }
 0x265   :  { %1916 = vmatmul.mubr.msk.f32.gmra.mrb[22].mxu0 %vm131_vm0, %v701_v27 }
 0x266   :  { %v639_v22 = vpop.f32.mrb[80].mxu1 }
 0x267   :  { %v702_v21 = vmax.f32 %v639_v22, 0.0  ;;  %v641_v23 = vpop.f32.mrb[81].mxu1 }
 0x269   :  { %1918 = vmatprep.mubr.msk.f32.mxu0 %vm131_vm0, %v702_v21 }
 0x26a   :  { %v644_v20 = vpop.f32.mrb[82].mxu1 }
 0x26b   :  { %v703_v11 = vmax.f32 %v644_v20, 0.0  ;;  %v646_v9 = vpop.f32.mrb[83].mxu1 }
 0x26d   :  { %1919 = vmatmul.mubr.msk.f32.gmra.mrb[24].mxu0 %vm131_vm0, %v703_v11 }
 0x26e   :  { %v649_v10 = vpop.f32.mrb[84].mxu1 }
 0x26f   :  { %v704_v38 = vmax.f32 %v649_v10, 0.0  ;;  %v651_v19 = vpop.f32.mrb[85].mxu1 }
 0x271   :  { %1921 = vmatprep.mubr.msk.f32.mxu0 %vm131_vm0, %v704_v38 }
 0x272   :  { %v654_v25 = vpop.f32.mrb[86].mxu1 }
 0x273   :  { %v705_v24 = vmax.f32 %v654_v25, 0.0  ;;  %v656_v18 = vpop.f32.mrb[87].mxu1 }
 0x275   :  { %1922 = vmatmul.mubr.msk.f32.gmra.mrb[26].mxu0 %vm131_vm0, %v705_v24 }
 0x276   :  { %v659_v27 = vpop.f32.mrb[88].mxu1 }
 0x277   :  { %v706_v22 = vmax.f32 %v659_v27, 0.0  ;;  %v661_v23 = vpop.f32.mrb[89].mxu1 }
 0x278   :  { %v3192_v23 = vmov 0.0|0.0  }
 0x279   :  { %1924 = vmatprep.mubr.msk.f32.mxu0 %vm131_vm0, %v706_v22 }
 0x27a   :  { %v664_v21 = vpop.f32.mrb[90].mxu1 }
 0x27b   :  { %v707_v20 = vmax.f32 %v664_v21, 0.0  ;;  %v666_v9 = vpop.f32.mrb[91].mxu1 }
 0x27d   :  { %1925 = vmatmul.mubr.msk.f32.gmra.mrb[28].mxu0 %vm131_vm0, %v707_v20 }
 0x27e   :  { %v669_v11 = vpop.f32.mrb[92].mxu1 }
 0x27f   :  { %v708_v10 = vmax.f32 %v669_v11, 0.0  ;;  %v671_v19 = vpop.f32.mrb[93].mxu1 }
 0x281   :  { %1927 = vmatprep.mubr.msk.f32.mxu0 %vm131_vm0, %v708_v10 }
 0x282   :  { %v674_v38 = vpop.f32.mrb[94].mxu1 }
 0x283   :  { %v709_v25 = vmax.f32 %v674_v38, 0.0  ;;  %v676_v18 = vpop.f32.mrb[95].mxu1 }
 0x285   :  { %1928 = vmatmul.mubr.msk.f32.gmra.mrb[30].mxu0 %vm131_vm0, %v709_v25 }
 0x286   :  { %1099 = vmatprep.mubr.f32.mxu0 %v2380_v39 }
 0x2e0   :  { %v1884_v24 = vpop.f32.mrb[0].mxu0 }
 0x2e1   :  { %v876_v27 = vpop.f32.mrb[1].mxu0 }
 0x2e2   :  { %v1995_v22 = vpack.c.bf16 %v1884_v24, %v876_v27 }
 0x2e4   :  { %1996 = vmatpush1.bf16.msra.mxu0 %v1995_v22 }
 0x2e5   :  { %1997 = vmatprep.subr.bf16.mxu0 %v3192_v23 }
 0x2e8   :  { %v1887_v21 = vpop.f32.mrb[2].mxu0 }
 0x2e9   :  { %v886_v20 = vpop.f32.mrb[3].mxu0 }
 0x2ea   :  { %v1998_v9 = vpack.c.bf16 %v1887_v21, %v886_v20 }
 0x2ec   :  { %1999 = vmatpush1.bf16.msra.mxu0 %v1998_v9 }
 0x2ed   :  { %2000 = vmatprep.subr.bf16.mxu0 %v3192_v23 }
 0x2f0   :  { %v1890_v11 = vpop.f32.mrb[4].mxu0 }
 0x2f1   :  { %v896_v10 = vpop.f32.mrb[5].mxu0 }
 0x2f2   :  { %v2001_v19 = vpack.c.bf16 %v1890_v11, %v896_v10 }
 0x2f4   :  { %2002 = vmatpush1.bf16.msra.mxu0 %v2001_v19 }
 0x2f5   :  { %2003 = vmatprep.subr.bf16.mxu0 %v3192_v23 }
 0x2f8   :  { %v1893_v38 = vpop.f32.mrb[6].mxu0 }
 0x2f9   :  { %v906_v39 = vpop.f32.mrb[7].mxu0 }
 0x2fa   :  { %v2004_v25 = vpack.c.bf16 %v1893_v38, %v906_v39 }
 0x2fc   :  { %2005 = vmatpush1.bf16.msra.mxu0 %v2004_v25 }
 0x2fd   :  { %2006 = vmatprep.subr.bf16.mxu0 %v3192_v23 }
 0x300   :  { %v1896_v18 = vpop.f32.mrb[8].mxu0 }
 0x301   :  { %v916_v24 = vpop.f32.mrb[9].mxu0 }
 0x302   :  { %v2007_v27 = vpack.c.bf16 %v1896_v18, %v916_v24 }
 0x304   :  { %2008 = vmatpush1.bf16.msra.mxu0 %v2007_v27 }
 0x305   :  { %2009 = vmatprep.subr.bf16.mxu0 %v3192_v23 }
 0x308   :  { %v1899_v22 = vpop.f32.mrb[10].mxu0 }
 0x309   :  { %v926_v21 = vpop.f32.mrb[11].mxu0 }
 0x30a   :  { %v2010_v20 = vpack.c.bf16 %v1899_v22, %v926_v21 }
 0x30c   :  { %2011 = vmatpush1.bf16.msra.mxu0 %v2010_v20 }
 0x30d   :  { %2012 = vmatprep.subr.bf16.mxu0 %v3192_v23 }
 0x310   :  { %v1902_v9 = vpop.f32.mrb[12].mxu0 }
 0x311   :  { %v936_v11 = vpop.f32.mrb[13].mxu0 }
 0x312   :  { %v2013_v10 = vpack.c.bf16 %v1902_v9, %v936_v11 }
 0x314   :  { %2014 = vmatpush1.bf16.msra.mxu0 %v2013_v10 }
 0x315   :  { %2015 = vmatprep.subr.bf16.mxu0 %v3192_v23 }
 0x318   :  { %v1905_v19 = vpop.f32.mrb[14].mxu0 }
 0x319   :  { %v946_v38 = vpop.f32.mrb[15].mxu0 }
 0x31a   :  { %v2016_v39 = vpack.c.bf16 %v1905_v19, %v946_v38 }
 0x31c   :  { %2017 = vmatpush1.bf16.msra.mxu0 %v2016_v39 }
 0x31d   :  { %2018 = vmatprep.subr.bf16.mxu0 %v3192_v23 }
 0x320   :  { %v1908_v25 = vpop.f32.mrb[16].mxu0 }
 0x321   :  { %v956_v18 = vpop.f32.mrb[17].mxu0 }
 0x322   :  { %v2019_v24 = vpack.c.bf16 %v1908_v25, %v956_v18 }
 0x324   :  { %2020 = vmatpush1.bf16.msra.mxu0 %v2019_v24 }
 0x325   :  { %2021 = vmatprep.subr.bf16.mxu0 %v3192_v23 }
 0x328   :  { %v1911_v27 = vpop.f32.mrb[18].mxu0 }
 0x329   :  { %v966_v22 = vpop.f32.mrb[19].mxu0 }
 0x32a   :  { %v2022_v21 = vpack.c.bf16 %v1911_v27, %v966_v22 }
 0x32c   :  { %2023 = vmatpush1.bf16.msra.mxu0 %v2022_v21 }
 0x32d   :  { %2024 = vmatprep.subr.bf16.mxu0 %v3192_v23 }
 0x330   :  { %v1914_v20 = vpop.f32.mrb[20].mxu0 }
 0x331   :  { %v976_v9 = vpop.f32.mrb[21].mxu0 }
 0x332   :  { %v2025_v11 = vpack.c.bf16 %v1914_v20, %v976_v9 }
 0x334   :  { %2026 = vmatpush1.bf16.msra.mxu0 %v2025_v11 }
 0x335   :  { %2027 = vmatprep.subr.bf16.mxu0 %v3192_v23 }
 0x338   :  { %v1917_v10 = vpop.f32.mrb[22].mxu0 }
 0x339   :  { %v986_v19 = vpop.f32.mrb[23].mxu0 }
 0x33a   :  { %v2028_v38 = vpack.c.bf16 %v1917_v10, %v986_v19 }
 0x33c   :  { %2029 = vmatpush1.bf16.msra.mxu0 %v2028_v38 }
 0x33d   :  { %2030 = vmatprep.subr.bf16.mxu0 %v3192_v23 }
 0x340   :  { %v1920_v39 = vpop.f32.mrb[24].mxu0 }
 0x341   :  { %v996_v25 = vpop.f32.mrb[25].mxu0 }
 0x342   :  { %v2031_v18 = vpack.c.bf16 %v1920_v39, %v996_v25 }
 0x344   :  { %2032 = vmatpush1.bf16.msra.mxu0 %v2031_v18 }
 0x345   :  { %2033 = vmatprep.subr.bf16.mxu0 %v3192_v23 }
 0x348   :  { %v1923_v24 = vpop.f32.mrb[26].mxu0 }
 0x349   :  { %v1006_v27 = vpop.f32.mrb[27].mxu0 }
 0x34a   :  { %v2034_v22 = vpack.c.bf16 %v1923_v24, %v1006_v27 }
 0x34c   :  { %2035 = vmatpush1.bf16.msra.mxu0 %v2034_v22 }
 0x34d   :  { %2036 = vmatprep.subr.bf16.mxu0 %v3192_v23 }
 0x350   :  { %v1926_v21 = vpop.f32.mrb[28].mxu0 }
 0x351   :  { %v1016_v20 = vpop.f32.mrb[29].mxu0 }
 0x352   :  { %v2037_v9 = vpack.c.bf16 %v1926_v21, %v1016_v20 }
 0x354   :  { %2038 = vmatpush1.bf16.msra.mxu0 %v2037_v9 }
 0x355   :  { %2039 = vmatprep.subr.bf16.mxu0 %v3192_v23 }
 0x358   :  { %v1929_v11 = vpop.f32.mrb[30].mxu0 }
 0x359   :  { %v1026_v10 = vpop.f32.mrb[31].mxu0 }
 0x35a   :  { %v2040_v19 = vpack.c.bf16 %v1929_v11, %v1026_v10 }
 0x35c   :  { %2041 = vmatpush1.bf16.msra.mxu0 %v2040_v19 }
 0x35f   :  { %1100 = vmatmul.mubr.f32.vlgmr.msra.gmra.mrb[32].mxu0 %v2404_v26  ;;  %v3193_v26 = vld [vmem:[#allocation5_spill] sm:$0xff] }
 0x360   :  { %1104 = vmatprep.mubr.f32.mxu0 %v2406_v28  ;;  %v3194_v28 = vld [vmem:[#allocation6_spill] sm:$0xff] }
 0x363   :  { %1105 = vmatmul.mubr.f32.gmra.mrb[34].mxu0 %v2410_v29  ;;  %v3195_v29 = vld [vmem:[#allocation7_spill] sm:$0xff] }
 0x364   :  { %1109 = vmatprep.mubr.f32.mxu0 %v2412_v30  ;;  %v3196_v30 = vld [vmem:[#allocation8_spill] sm:$0xff] }
 0x367   :  { %1110 = vmatmul.mubr.f32.gmra.mrb[36].mxu0 %v2416_v31  ;;  %v3197_v31 = vld [vmem:[#allocation9_spill] sm:$0xff] }
 0x368   :  { %1114 = vmatprep.mubr.f32.mxu0 %v2418_v32  ;;  %v3198_v32 = vld [vmem:[#allocation10_spill] sm:$0xff] }
 0x36b   :  { %1115 = vmatmul.mubr.f32.gmra.mrb[38].mxu0 %v2422_v33  ;;  %v3199_v33 = vld [vmem:[#allocation11_spill] sm:$0xff] }
 0x36c   :  { %1119 = vmatprep.mubr.f32.mxu0 %v2424_v34  ;;  %v3200_v34 = vld [vmem:[#allocation12_spill] sm:$0xff] }
 0x36f   :  { %1120 = vmatmul.mubr.f32.gmra.mrb[40].mxu0 %v2428_v35  ;;  %v3201_v35 = vld [vmem:[#allocation13_spill] sm:$0xff] }
 0x370   :  { %1124 = vmatprep.mubr.f32.mxu0 %v2430_v36  ;;  %v3202_v36 = vld [vmem:[#allocation14_spill] sm:$0xff] }
 0x373   :  { %1125 = vmatmul.mubr.f32.gmra.mrb[42].mxu0 %v2434_v37  ;;  %v3203_v37 = vld [vmem:[#allocation15_spill] sm:$0xff] }
 0x374   :  { %1129 = vmatprep.mubr.f32.mxu0 %v2436_v40  ;;  %v3204_v40 = vld [vmem:[#allocation16_spill] sm:$0xff] }
 0x377   :  { %1130 = vmatmul.mubr.f32.gmra.mrb[44].mxu0 %v2440_v41  ;;  %v3205_v41 = vld [vmem:[#allocation17_spill] sm:$0xff] }
 0x378   :  { %1134 = vmatprep.mubr.f32.mxu0 %v2442_v42 }
 0x37b   :  { %1135 = vmatmul.mubr.f32.gmra.mrb[46].mxu0 %v2446_v43 }
 0x37c   :  { %1139 = vmatprep.mubr.f32.mxu0 %v2448_v44 }
 0x37f   :  { %1140 = vmatmul.mubr.f32.gmra.mrb[48].mxu0 %v2452_v45 }
 0x380   :  { %1144 = vmatprep.mubr.f32.mxu0 %v2454_v46 }
 0x383   :  { %1145 = vmatmul.mubr.f32.gmra.mrb[50].mxu0 %v2458_v47 }
 0x384   :  { %1149 = vmatprep.mubr.f32.mxu0 %v2460_v48 }
 0x387   :  { %1150 = vmatmul.mubr.f32.gmra.mrb[52].mxu0 %v2464_v49 }
 0x388   :  { %1154 = vmatprep.mubr.f32.mxu0 %v2466_v50 }
 0x38b   :  { %1155 = vmatmul.mubr.f32.gmra.mrb[54].mxu0 %v2470_v51 }
 0x38c   :  { %1159 = vmatprep.mubr.f32.mxu0 %v2472_v52 }
 0x38f   :  { %1160 = vmatmul.mubr.f32.gmra.mrb[56].mxu0 %v2476_v53 }
 0x390   :  { %1164 = vmatprep.mubr.f32.mxu0 %v2478_v54 }
 0x393   :  { %1165 = vmatmul.mubr.f32.gmra.mrb[58].mxu0 %v2482_v55 }
 0x394   :  { %1169 = vmatprep.mubr.f32.mxu0 %v2484_v56 }
 0x397   :  { %1170 = vmatmul.mubr.f32.gmra.mrb[60].mxu0 %v2488_v57 }
 0x398   :  { %1174 = vmatprep.mubr.f32.mxu0 %v2490_v58 }
 0x39b   :  { %1175 = vmatmul.mubr.f32.gmra.mrb[62].mxu0 %v2494_v59 }
 0x39c   :  { %1179 = vmatprep.mubr.f32.mxu0 %v2496_v60 }
 0x39f   :  { %1180 = vmatmul.mubr.f32.gmra.mrb[64].mxu0 %v2500_v61 }
 0x3a0   :  { %1184 = vmatprep.mubr.f32.mxu0 %v2502_v62 }
 0x3a3   :  { %1185 = vmatmul.mubr.f32.gmra.mrb[66].mxu0 %v2506_v63 }
 0x3a4   :  { %1189 = vmatprep.mubr.f32.mxu0 %v2508_v0 }
 0x3a7   :  { %1190 = vmatmul.mubr.f32.gmra.mrb[68].mxu0 %v2512_v1 }
 0x3a8   :  { %1194 = vmatprep.mubr.f32.mxu0 %v2514_v2 }
 0x3ab   :  { %1195 = vmatmul.mubr.f32.gmra.mrb[70].mxu0 %v2518_v3 }
 0x3ac   :  { %1199 = vmatprep.mubr.f32.mxu0 %v2520_v4 }
 0x3af   :  { %1200 = vmatmul.mubr.f32.gmra.mrb[72].mxu0 %v2524_v5 }
 0x3b0   :  { %1204 = vmatprep.mubr.f32.mxu0 %v2526_v6 }
 0x3b3   :  { %1205 = vmatmul.mubr.f32.gmra.mrb[74].mxu0 %v2530_v7 }
 0x3b4   :  { %1209 = vmatprep.mubr.f32.mxu0 %v2532_v8 }
 0x3b7   :  { %1210 = vmatmul.mubr.f32.gmra.mrb[76].mxu0 %v2542_v12 }
 0x3b8   :  { %1214 = vmatprep.mubr.f32.mxu0 %v2544_v13 }
 0x3bb   :  { %1215 = vmatmul.mubr.f32.gmra.mrb[78].mxu0 %v2549_v14 }
 0x3bc   :  { %1219 = vmatprep.mubr.f32.mxu0 %v2551_v15 }
 0x3bf   :  { %1220 = vmatmul.mubr.f32.gmra.mrb[80].mxu0 %v2555_v16 }
 0x3c0   :  { %1224 = vmatprep.mubr.f32.mxu0 %v2557_v17 }
 0x3c3   :  { %1225 = vmatmul.mubr.f32.gmra.mrb[82].mxu0 %v3193_v26 }
 0x3c4   :  { %1229 = vmatprep.mubr.f32.mxu0 %v3194_v28 }
 0x3c7   :  { %1230 = vmatmul.mubr.f32.gmra.mrb[84].mxu0 %v3195_v29 }
 0x3c8   :  { %1234 = vmatprep.mubr.f32.mxu0 %v3196_v30 }
 0x3cb   :  { %1235 = vmatmul.mubr.f32.gmra.mrb[86].mxu0 %v3197_v31 }
 0x3cc   :  { %1239 = vmatprep.mubr.f32.mxu0 %v3198_v32 }
 0x3cf   :  { %1240 = vmatmul.mubr.f32.gmra.mrb[88].mxu0 %v3199_v33 }
 0x3d0   :  { %1244 = vmatprep.mubr.f32.mxu0 %v3200_v34 }
 0x3d3   :  { %1245 = vmatmul.mubr.f32.gmra.mrb[90].mxu0 %v3201_v35 }
 0x3d4   :  { %1249 = vmatprep.mubr.f32.mxu0 %v3202_v36 }
 0x3d7   :  { %1250 = vmatmul.mubr.f32.gmra.mrb[92].mxu0 %v3203_v37 }
 0x3d8   :  { %1254 = vmatprep.mubr.f32.mxu0 %v3204_v40 }
 0x3db   :  { %1255 = vmatmul.mubr.f32.gmra.mrb[94].mxu0 %v3205_v41 }
 0x432   :  { %v2711_v42 = vpop.f32.mrb[32].mxu0 }
 0x433   :  { %v1103_v43 = vpop.f32.mrb[33].mxu0  ;;  %v1261_v44 = vsel %vm1260_vm1, %v2711_v42, -inf }
 0x434   :  { %1262 = vmax.xlane.f32.xlu0 %v1261_v44 }
 0x436   :  { %v2715_v45 = vpop.f32.mrb[34].mxu0 }
 0x437   :  { %v1108_v46 = vpop.f32.mrb[35].mxu0  ;;  %v1264_v47 = vsel %vm1260_vm1, %v2715_v45, -inf }
 0x438   :  { %1265 = vmax.xlane.f32.xlu0 %v1264_v47 }
 0x43a   :  { %v2719_v48 = vpop.f32.mrb[36].mxu0 }
 0x43b   :  { %v1113_v49 = vpop.f32.mrb[37].mxu0  ;;  %v1267_v50 = vsel %vm1260_vm1, %v2719_v48, -inf }
 0x43c   :  { %1268 = vmax.xlane.f32.xlu1 %v1267_v50 }
 0x43e   :  { %v2723_v51 = vpop.f32.mrb[38].mxu0 }
 0x43f   :  { %v1118_v52 = vpop.f32.mrb[39].mxu0  ;;  %v1270_v53 = vsel %vm1260_vm1, %v2723_v51, -inf }
 0x440   :  { %1271 = vmax.xlane.f32.xlu1 %v1270_v53 }
 0x442   :  { %v2727_v54 = vpop.f32.mrb[40].mxu0 }
 0x443   :  { %v1123_v55 = vpop.f32.mrb[41].mxu0  ;;  %v1273_v56 = vsel %vm1260_vm1, %v2727_v54, -inf }
 0x444   :  { %1274 = vmax.xlane.f32.xlu0 %v1273_v56 }
 0x446   :  { %v2731_v57 = vpop.f32.mrb[42].mxu0 }
 0x447   :  { %v1128_v58 = vpop.f32.mrb[43].mxu0  ;;  %v1276_v59 = vsel %vm1260_vm1, %v2731_v57, -inf }
 0x448   :  { %1277 = vmax.xlane.f32.xlu1 %v1276_v59 }
 0x44a   :  { %v2735_v60 = vpop.f32.mrb[44].mxu0 }
 0x44b   :  { %v1133_v61 = vpop.f32.mrb[45].mxu0  ;;  %v1279_v62 = vsel %vm1260_vm1, %v2735_v60, -inf }
 0x44c   :  { %1280 = vmax.xlane.f32.xlu0 %v1279_v62 }
 0x44e   :  { %v2739_v63 = vpop.f32.mrb[46].mxu0 }
 0x44f   :  { %v1138_v0 = vpop.f32.mrb[47].mxu0  ;;  %v1282_v1 = vsel %vm1260_vm1, %v2739_v63, -inf }
 0x450   :  { %1283 = vmax.xlane.f32.xlu1 %v1282_v1 }
 0x452   :  { %v2743_v2 = vpop.f32.mrb[48].mxu0 }
 0x453   :  { %v1143_v3 = vpop.f32.mrb[49].mxu0  ;;  %v1285_v4 = vsel %vm1260_vm1, %v2743_v2, -inf }
 0x454   :  { %1286 = vmax.xlane.f32.xlu0 %v1285_v4 }
 0x456   :  { %v2747_v5 = vpop.f32.mrb[50].mxu0 }
 0x457   :  { %v1148_v6 = vpop.f32.mrb[51].mxu0  ;;  %v1288_v7 = vsel %vm1260_vm1, %v2747_v5, -inf }
 0x458   :  { %1289 = vmax.xlane.f32.xlu1 %v1288_v7 }
 0x45a   :  { %v2751_v8 = vpop.f32.mrb[52].mxu0 }
 0x45b   :  { %v1153_v12 = vpop.f32.mrb[53].mxu0  ;;  %v1291_v13 = vsel %vm1260_vm1, %v2751_v8, -inf }
 0x45c   :  { %1292 = vmax.xlane.f32.xlu0 %v1291_v13 }
 0x45e   :  { %v2755_v14 = vpop.f32.mrb[54].mxu0 }
 0x45f   :  { %v1158_v15 = vpop.f32.mrb[55].mxu0  ;;  %v1294_v16 = vsel %vm1260_vm1, %v2755_v14, -inf }
 0x460   :  { %1295 = vmax.xlane.f32.xlu1 %v1294_v16 }
 0x462   :  { %v2759_v17 = vpop.f32.mrb[56].mxu0 }
 0x463   :  { %v1163_v23 = vpop.f32.mrb[57].mxu0  ;;  %v1297_v38 = vsel %vm1260_vm1, %v2759_v17, -inf }
 0x464   :  { %1298 = vmax.xlane.f32.xlu0 %v1297_v38 }
 0x466   :  { %v2763_v39 = vpop.f32.mrb[58].mxu0 }
 0x467   :  { %v1168_v25 = vpop.f32.mrb[59].mxu0  ;;  %v1300_v18 = vsel %vm1260_vm1, %v2763_v39, -inf }
 0x468   :  { %1301 = vmax.xlane.f32.xlu1 %v1300_v18 }
 0x46a   :  { %v2767_v24 = vpop.f32.mrb[60].mxu0 }
 0x46b   :  { %v1173_v27 = vpop.f32.mrb[61].mxu0  ;;  %v1303_v22 = vsel %vm1260_vm1, %v2767_v24, -inf }
 0x46c   :  { %1304 = vmax.xlane.f32.xlu0 %v1303_v22 }
 0x46e   :  { %v2771_v21 = vpop.f32.mrb[62].mxu0 }
 0x46f   :  { %v1178_v20 = vpop.f32.mrb[63].mxu0  ;;  %v1306_v9 = vsel %vm1260_vm1, %v2771_v21, -inf }
 0x470   :  { %1307 = vmax.xlane.f32.xlu1 %v1306_v9 }
 0x472   :  { %v2775_v11 = vpop.f32.mrb[64].mxu0 }
 0x473   :  { %v1183_v10 = vpop.f32.mrb[65].mxu0  ;;  %v1309_v19 = vsel %vm1260_vm1, %v2775_v11, -inf }
 0x474   :  { %1310 = vmax.xlane.f32.xlu0 %v1309_v19 }
 0x476   :  { %v2779_v26 = vpop.f32.mrb[66].mxu0 }
 0x477   :  { %v1188_v28 = vpop.f32.mrb[67].mxu0  ;;  %v1312_v29 = vsel %vm1260_vm1, %v2779_v26, -inf }
 0x478   :  { %1313 = vmax.xlane.f32.xlu1 %v1312_v29 }
 0x47a   :  { %v2783_v30 = vpop.f32.mrb[68].mxu0 }
 0x47b   :  { %v1193_v31 = vpop.f32.mrb[69].mxu0  ;;  %v1315_v32 = vsel %vm1260_vm1, %v2783_v30, -inf }
 0x47c   :  { %1316 = vmax.xlane.f32.xlu0 %v1315_v32 }
 0x47e   :  { %v2787_v33 = vpop.f32.mrb[70].mxu0 }
 0x47f   :  { %v1198_v34 = vpop.f32.mrb[71].mxu0  ;;  %v1318_v35 = vsel %vm1260_vm1, %v2787_v33, -inf }
 0x480   :  { %1319 = vmax.xlane.f32.xlu1 %v1318_v35 }
 0x482   :  { %v2791_v36 = vpop.f32.mrb[72].mxu0 }
 0x483   :  { %v1203_v37 = vpop.f32.mrb[73].mxu0  ;;  %v1321_v40 = vsel %vm1260_vm1, %v2791_v36, -inf }
 0x484   :  { %1322 = vmax.xlane.f32.xlu0 %v1321_v40 }
 0x486   :  { %v2795_v41 = vpop.f32.mrb[74].mxu0 }
 0x487   :  { %v1208_v43 = vpop.f32.mrb[75].mxu0  ;;  %v1324_v44 = vsel %vm1260_vm1, %v2795_v41, -inf }
 0x488   :  { %1325 = vmax.xlane.f32.xlu1 %v1324_v44 }
 0x48a   :  { %v2799_v46 = vpop.f32.mrb[76].mxu0 }
 0x48b   :  { %v1213_v47 = vpop.f32.mrb[77].mxu0  ;;  %v1327_v49 = vsel %vm1260_vm1, %v2799_v46, -inf }
 0x48c   :  { %1328 = vmax.xlane.f32.xlu0 %v1327_v49 }
 0x48e   :  { %v2803_v50 = vpop.f32.mrb[78].mxu0 }
 0x48f   :  { %v1218_v52 = vpop.f32.mrb[79].mxu0  ;;  %v1330_v53 = vsel %vm1260_vm1, %v2803_v50, -inf }
 0x490   :  { %1331 = vmax.xlane.f32.xlu1 %v1330_v53 }
 0x492   :  { %v2807_v55 = vpop.f32.mrb[80].mxu0 }
 0x493   :  { %v1223_v56 = vpop.f32.mrb[81].mxu0  ;;  %v1333_v58 = vsel %vm1260_vm1, %v2807_v55, -inf }
 0x494   :  { %1334 = vmax.xlane.f32.xlu0 %v1333_v58 }
 0x496   :  { %v2811_v59 = vpop.f32.mrb[82].mxu0 }
 0x497   :  { %v1228_v61 = vpop.f32.mrb[83].mxu0  ;;  %v1336_v62 = vsel %vm1260_vm1, %v2811_v59, -inf }
 0x498   :  { %1337 = vmax.xlane.f32.xlu1 %v1336_v62 }
 0x49a   :  { %v2815_v0 = vpop.f32.mrb[84].mxu0 }
 0x49b   :  { %v1233_v1 = vpop.f32.mrb[85].mxu0  ;;  %v1339_v3 = vsel %vm1260_vm1, %v2815_v0, -inf }
 0x49c   :  { %1340 = vmax.xlane.f32.xlu0 %v1339_v3 }
 0x49e   :  { %v2819_v4 = vpop.f32.mrb[86].mxu0 }
 0x49f   :  { %v1238_v6 = vpop.f32.mrb[87].mxu0  ;;  %v1342_v7 = vsel %vm1260_vm1, %v2819_v4, -inf }
 0x4a0   :  { %1343 = vmax.xlane.f32.xlu1 %v1342_v7 }
 0x4a2   :  { %v2823_v12 = vpop.f32.mrb[88].mxu0 }
 0x4a3   :  { %v1243_v13 = vpop.f32.mrb[89].mxu0  ;;  %v1345_v15 = vsel %vm1260_vm1, %v2823_v12, -inf }
 0x4a4   :  { %1346 = vmax.xlane.f32.xlu0 %v1345_v15 }
 0x4a6   :  { %v2827_v16 = vpop.f32.mrb[90].mxu0 }
 0x4a7   :  { %v1248_v23 = vpop.f32.mrb[91].mxu0  ;;  %v1348_v38 = vsel %vm1260_vm1, %v2827_v16, -inf }
 0x4a8   :  { %1349 = vmax.xlane.f32.xlu1 %v1348_v38 }
 0x4aa   :  { %v2831_v25 = vpop.f32.mrb[92].mxu0 }
 0x4ab   :  { %v1253_v18 = vpop.f32.mrb[93].mxu0  ;;  %v1351_v27 = vsel %vm1260_vm1, %v2831_v25, -inf }
 0x4ac   :  { %1352 = vmax.xlane.f32.xlu0 %v1351_v27 }
 0x4ae   :  { %v2835_v22 = vpop.f32.mrb[94].mxu0 }
 0x4af   :  { %v1258_v20 = vpop.f32.mrb[95].mxu0  ;;  %v1354_v9 = vsel %vm1260_vm1, %v2835_v22, -inf }
 0x4b0   :  { %1355 = vmax.xlane.f32.xlu1 %v1354_v9 }
 0x4c1   :  { %v1263_v10 = vpop.xlane.xlu0 %1262 }
 0x4c2   :  { %v2840_v19 = vsub.f32 %v2711_v42, %v1263_v10 }
 0x4c4   :  { %v1389_v28 = vmul.f32 1.442695, %v2840_v19 }
 0x4c5   :  { %v1266_v29 = vpop.xlane.xlu0 %1265 }
 0x4c6   :  { %2046 = vpow2.f32 %v1389_v28  ;;  %v2844_v31 = vsub.f32 %v2715_v45, %v1266_v29 }
 0x4c8   :  { %v1391_v32 = vmul.f32 1.442695, %v2844_v31 }
 0x4c9   :  { %v1269_v34 = vpop.xlane.xlu1 %1268 }
 0x4ca   :  { %2048 = vpow2.f32 %v1391_v32  ;;  %v2848_v35 = vsub.f32 %v2719_v48, %v1269_v34 }
 0x4cc   :  { %v1393_v37 = vmul.f32 1.442695, %v2848_v35 }
 0x4cd   :  { %v1272_v40 = vpop.xlane.xlu1 %1271 }
 0x4ce   :  { %2050 = vpow2.f32 %v1393_v37  ;;  %v2852_v42 = vsub.f32 %v2723_v51, %v1272_v40 }
 0x4d0   :  { %v2047_v43 = vpop.eup %2046  ;;  %v1395_v44 = vmul.f32 1.442695, %v2852_v42 }
 0x4d1   :  { %v1275_v47 = vpop.xlane.xlu0 %1274  ;;  %v1453_v45 = vsel %vm1260_vm1, %v2047_v43, 0.0 }
 0x4d2   :  { %2052 = vpow2.f32 %v1395_v44  ;;  %v2857_v49 = vsub.f32 %v2727_v54, %v1275_v47  ;;  %1454 = vadd.xlane.f32.xlu0 %v1453_v45 }
 0x4d4   :  { %v2049_v48 = vpop.eup %2048  ;;  %v1397_v52 = vmul.f32 1.442695, %v2857_v49 }
 0x4d5   :  { %v1278_v53 = vpop.xlane.xlu1 %1277  ;;  %v1456_v56 = vsel %vm1260_vm1, %v2049_v48, 0.0 }
 0x4d6   :  { %2054 = vpow2.f32 %v1397_v52  ;;  %v2862_v51 = vsub.f32 %v2731_v57, %v1278_v53  ;;  %1457 = vadd.xlane.f32.xlu1 %v1456_v56 }
 0x4d8   :  { %v2051_v58 = vpop.eup %2050  ;;  %v1399_v61 = vmul.f32 1.442695, %v2862_v51 }
 0x4d9   :  { %v1281_v62 = vpop.xlane.xlu0 %1280  ;;  %v1459_v1 = vsel %vm1260_vm1, %v2051_v58, 0.0 }
 0x4da   :  { %2056 = vpow2.f32 %v1399_v61  ;;  %v2867_v54 = vsub.f32 %v2735_v60, %v1281_v62  ;;  %1460 = vadd.xlane.f32.xlu0 %v1459_v1 }
 0x4dc   :  { %v2053_v3 = vpop.eup %2052  ;;  %v1401_v6 = vmul.f32 1.442695, %v2867_v54 }
 0x4dd   :  { %v1284_v7 = vpop.xlane.xlu1 %1283  ;;  %v1462_v13 = vsel %vm1260_vm1, %v2053_v3, 0.0 }
 0x4de   :  { %2058 = vpow2.f32 %v1401_v6  ;;  %v2872_v57 = vsub.f32 %v2739_v63, %v1284_v7  ;;  %1463 = vadd.xlane.f32.xlu1 %v1462_v13 }
 0x4e0   :  { %v2055_v15 = vpop.eup %2054  ;;  %v1403_v23 = vmul.f32 1.442695, %v2872_v57 }
 0x4e1   :  { %v1287_v38 = vpop.xlane.xlu0 %1286  ;;  %v1465_v18 = vsel %vm1260_vm1, %v2055_v15, 0.0 }
 0x4e2   :  { %2060 = vpow2.f32 %v1403_v23  ;;  %v2877_v60 = vsub.f32 %v2743_v2, %v1287_v38  ;;  %1466 = vadd.xlane.f32.xlu0 %v1465_v18 }
 0x4e4   :  { %v2057_v27 = vpop.eup %2056  ;;  %v1405_v20 = vmul.f32 1.442695, %v2877_v60 }
 0x4e5   :  { %v1290_v9 = vpop.xlane.xlu1 %1289  ;;  %v1468_v10 = vsel %vm1260_vm1, %v2057_v27, 0.0 }
 0x4e6   :  { %2062 = vpow2.f32 %v1405_v20  ;;  %v2882_v63 = vsub.f32 %v2747_v5, %v1290_v9  ;;  %1469 = vadd.xlane.f32.xlu1 %v1468_v10 }
 0x4e8   :  { %v2059_v28 = vpop.eup %2058  ;;  %v1407_v29 = vmul.f32 1.442695, %v2882_v63 }
 0x4e9   :  { %v1293_v32 = vpop.xlane.xlu0 %1292  ;;  %v1471_v34 = vsel %vm1260_vm1, %v2059_v28, 0.0 }
 0x4ea   :  { %2064 = vpow2.f32 %v1407_v29  ;;  %v2887_v2 = vsub.f32 %v2751_v8, %v1293_v32  ;;  %1472 = vadd.xlane.f32.xlu0 %v1471_v34 }
 0x4ec   :  { %v2061_v37 = vpop.eup %2060  ;;  %v1409_v40 = vmul.f32 1.442695, %v2887_v2 }
 0x4ed   :  { %v1296_v43 = vpop.xlane.xlu1 %1295  ;;  %v1474_v44 = vsel %vm1260_vm1, %v2061_v37, 0.0 }
 0x4ee   :  { %2066 = vpow2.f32 %v1409_v40  ;;  %v2892_v5 = vsub.f32 %v2755_v14, %v1296_v43  ;;  %1475 = vadd.xlane.f32.xlu1 %v1474_v44 }
 0x4f0   :  { %v2063_v47 = vpop.eup %2062  ;;  %v1411_v45 = vmul.f32 1.442695, %v2892_v5 }
 0x4f1   :  { %v1299_v48 = vpop.xlane.xlu0 %1298  ;;  %v1477_v52 = vsel %vm1260_vm1, %v2063_v47, 0.0 }
 0x4f2   :  { %2068 = vpow2.f32 %v1411_v45  ;;  %v2897_v8 = vsub.f32 %v2759_v17, %v1299_v48  ;;  %1478 = vadd.xlane.f32.xlu0 %v1477_v52 }
 0x4f4   :  { %v2065_v53 = vpop.eup %2064  ;;  %v1413_v56 = vmul.f32 1.442695, %v2897_v8 }
 0x4f5   :  { %v1302_v58 = vpop.xlane.xlu1 %1301  ;;  %v1480_v61 = vsel %vm1260_vm1, %v2065_v53, 0.0 }
 0x4f6   :  { %2070 = vpow2.f32 %v1413_v56  ;;  %v2902_v14 = vsub.f32 %v2763_v39, %v1302_v58  ;;  %1481 = vadd.xlane.f32.xlu1 %v1480_v61 }
 0x4f8   :  { %v2067_v62 = vpop.eup %2066  ;;  %v1415_v1 = vmul.f32 1.442695, %v2902_v14 }
 0x4f9   :  { %v1305_v3 = vpop.xlane.xlu0 %1304  ;;  %v1483_v6 = vsel %vm1260_vm1, %v2067_v62, 0.0 }
 0x4fa   :  { %2072 = vpow2.f32 %v1415_v1  ;;  %v2907_v17 = vsub.f32 %v2767_v24, %v1305_v3  ;;  %1484 = vadd.xlane.f32.xlu0 %v1483_v6 }
 0x4fc   :  { %v2069_v7 = vpop.eup %2068  ;;  %v1417_v13 = vmul.f32 1.442695, %v2907_v17 }
 0x4fd   :  { %v1308_v15 = vpop.xlane.xlu1 %1307  ;;  %v1486_v23 = vsel %vm1260_vm1, %v2069_v7, 0.0 }
 0x4fe   :  { %2074 = vpow2.f32 %v1417_v13  ;;  %v2912_v39 = vsub.f32 %v2771_v21, %v1308_v15  ;;  %1487 = vadd.xlane.f32.xlu1 %v1486_v23 }
 0x500   :  { %v2071_v38 = vpop.eup %2070  ;;  %v1419_v18 = vmul.f32 1.442695, %v2912_v39 }
 0x501   :  { %v1311_v27 = vpop.xlane.xlu0 %1310  ;;  %v1489_v20 = vsel %vm1260_vm1, %v2071_v38, 0.0 }
 0x502   :  { %2076 = vpow2.f32 %v1419_v18  ;;  %v2917_v24 = vsub.f32 %v2775_v11, %v1311_v27  ;;  %1490 = vadd.xlane.f32.xlu0 %v1489_v20 }
 0x504   :  { %v2073_v9 = vpop.eup %2072  ;;  %v1421_v10 = vmul.f32 1.442695, %v2917_v24 }
 0x505   :  { %v1314_v28 = vpop.xlane.xlu1 %1313  ;;  %v1492_v29 = vsel %vm1260_vm1, %v2073_v9, 0.0 }
 0x506   :  { %2078 = vpow2.f32 %v1421_v10  ;;  %v2922_v21 = vsub.f32 %v2779_v26, %v1314_v28  ;;  %1493 = vadd.xlane.f32.xlu1 %v1492_v29 }
 0x508   :  { %v2075_v32 = vpop.eup %2074  ;;  %v1423_v34 = vmul.f32 1.442695, %v2922_v21 }
 0x509   :  { %v1317_v37 = vpop.xlane.xlu0 %1316  ;;  %v1495_v40 = vsel %vm1260_vm1, %v2075_v32, 0.0 }
 0x50a   :  { %2080 = vpow2.f32 %v1423_v34  ;;  %v2927_v11 = vsub.f32 %v2783_v30, %v1317_v37  ;;  %1496 = vadd.xlane.f32.xlu0 %v1495_v40 }
 0x50c   :  { %v2077_v43 = vpop.eup %2076  ;;  %v1425_v44 = vmul.f32 1.442695, %v2927_v11 }
 0x50d   :  { %v1320_v47 = vpop.xlane.xlu1 %1319  ;;  %v1498_v45 = vsel %vm1260_vm1, %v2077_v43, 0.0 }
 0x50e   :  { %2082 = vpow2.f32 %v1425_v44  ;;  %v2932_v26 = vsub.f32 %v2787_v33, %v1320_v47  ;;  %1499 = vadd.xlane.f32.xlu1 %v1498_v45 }
 0x510   :  { %v2079_v48 = vpop.eup %2078  ;;  %v1427_v52 = vmul.f32 1.442695, %v2932_v26 }
 0x511   :  { %v1323_v53 = vpop.xlane.xlu0 %1322  ;;  %v1501_v56 = vsel %vm1260_vm1, %v2079_v48, 0.0 }
 0x512   :  { %2084 = vpow2.f32 %v1427_v52  ;;  %v2937_v30 = vsub.f32 %v2791_v36, %v1323_v53  ;;  %1502 = vadd.xlane.f32.xlu0 %v1501_v56 }
 0x514   :  { %v2081_v58 = vpop.eup %2080  ;;  %v1429_v61 = vmul.f32 1.442695, %v2937_v30 }
 0x515   :  { %v1326_v62 = vpop.xlane.xlu1 %1325  ;;  %v1504_v1 = vsel %vm1260_vm1, %v2081_v58, 0.0 }
 0x516   :  { %2086 = vpow2.f32 %v1429_v61  ;;  %v2942_v33 = vsub.f32 %v2795_v41, %v1326_v62  ;;  %1505 = vadd.xlane.f32.xlu1 %v1504_v1 }
 0x518   :  { %v2083_v3 = vpop.eup %2082  ;;  %v1431_v6 = vmul.f32 1.442695, %v2942_v33 }
 0x519   :  { %v1329_v7 = vpop.xlane.xlu0 %1328  ;;  %v1507_v13 = vsel %vm1260_vm1, %v2083_v3, 0.0 }
 0x51a   :  { %2088 = vpow2.f32 %v1431_v6  ;;  %v2947_v36 = vsub.f32 %v2799_v46, %v1329_v7  ;;  %1508 = vadd.xlane.f32.xlu0 %v1507_v13 }
 0x51c   :  { %v2085_v15 = vpop.eup %2084  ;;  %v1433_v23 = vmul.f32 1.442695, %v2947_v36 }
 0x51d   :  { %v1332_v38 = vpop.xlane.xlu1 %1331  ;;  %v1510_v18 = vsel %vm1260_vm1, %v2085_v15, 0.0 }
 0x51e   :  { %2090 = vpow2.f32 %v1433_v23  ;;  %v2952_v41 = vsub.f32 %v2803_v50, %v1332_v38  ;;  %1511 = vadd.xlane.f32.xlu1 %v1510_v18 }
 0x520   :  { %v2087_v27 = vpop.eup %2086  ;;  %v1435_v20 = vmul.f32 1.442695, %v2952_v41 }
 0x521   :  { %v1335_v9 = vpop.xlane.xlu0 %1334  ;;  %v1513_v10 = vsel %vm1260_vm1, %v2087_v27, 0.0 }
 0x522   :  { %2092 = vpow2.f32 %v1435_v20  ;;  %v2957_v46 = vsub.f32 %v2807_v55, %v1335_v9  ;;  %1514 = vadd.xlane.f32.xlu0 %v1513_v10 }
 0x524   :  { %v2089_v28 = vpop.eup %2088  ;;  %v1437_v29 = vmul.f32 1.442695, %v2957_v46 }
 0x525   :  { %v1338_v32 = vpop.xlane.xlu1 %1337  ;;  %v1516_v34 = vsel %vm1260_vm1, %v2089_v28, 0.0 }
 0x526   :  { %2094 = vpow2.f32 %v1437_v29  ;;  %v2962_v50 = vsub.f32 %v2811_v59, %v1338_v32  ;;  %1517 = vadd.xlane.f32.xlu1 %v1516_v34 }
 0x528   :  { %v2091_v37 = vpop.eup %2090  ;;  %v1439_v40 = vmul.f32 1.442695, %v2962_v50 }
 0x529   :  { %v1341_v43 = vpop.xlane.xlu0 %1340  ;;  %v1519_v44 = vsel %vm1260_vm1, %v2091_v37, 0.0 }
 0x52a   :  { %2096 = vpow2.f32 %v1439_v40  ;;  %v2967_v55 = vsub.f32 %v2815_v0, %v1341_v43  ;;  %1520 = vadd.xlane.f32.xlu0 %v1519_v44 }
 0x52c   :  { %v2093_v47 = vpop.eup %2092  ;;  %v1441_v45 = vmul.f32 1.442695, %v2967_v55 }
 0x52d   :  { %v1344_v48 = vpop.xlane.xlu1 %1343  ;;  %v1522_v52 = vsel %vm1260_vm1, %v2093_v47, 0.0 }
 0x52e   :  { %2098 = vpow2.f32 %v1441_v45  ;;  %v2972_v59 = vsub.f32 %v2819_v4, %v1344_v48  ;;  %1523 = vadd.xlane.f32.xlu1 %v1522_v52 }
 0x530   :  { %v2095_v53 = vpop.eup %2094  ;;  %v1443_v56 = vmul.f32 1.442695, %v2972_v59 }
 0x531   :  { %v1347_v58 = vpop.xlane.xlu0 %1346  ;;  %v1525_v61 = vsel %vm1260_vm1, %v2095_v53, 0.0 }
 0x532   :  { %2100 = vpow2.f32 %v1443_v56  ;;  %v2977_v0 = vsub.f32 %v2823_v12, %v1347_v58  ;;  %1526 = vadd.xlane.f32.xlu0 %v1525_v61 }
 0x534   :  { %v2097_v62 = vpop.eup %2096  ;;  %v1445_v1 = vmul.f32 1.442695, %v2977_v0 }
 0x535   :  { %v1350_v3 = vpop.xlane.xlu1 %1349  ;;  %v1528_v6 = vsel %vm1260_vm1, %v2097_v62, 0.0 }
 0x536   :  { %2102 = vpow2.f32 %v1445_v1  ;;  %v2982_v4 = vsub.f32 %v2827_v16, %v1350_v3  ;;  %1529 = vadd.xlane.f32.xlu1 %v1528_v6 }
 0x538   :  { %v2099_v7 = vpop.eup %2098  ;;  %v1447_v13 = vmul.f32 1.442695, %v2982_v4 }
 0x539   :  { %v1353_v15 = vpop.xlane.xlu0 %1352  ;;  %v1531_v23 = vsel %vm1260_vm1, %v2099_v7, 0.0 }
 0x53a   :  { %2104 = vpow2.f32 %v1447_v13  ;;  %v2987_v12 = vsub.f32 %v2831_v25, %v1353_v15  ;;  %1532 = vadd.xlane.f32.xlu0 %v1531_v23 }
 0x53c   :  { %v2101_v38 = vpop.eup %2100  ;;  %v1449_v18 = vmul.f32 1.442695, %v2987_v12 }
 0x53d   :  { %v1356_v27 = vpop.xlane.xlu1 %1355  ;;  %v1534_v20 = vsel %vm1260_vm1, %v2101_v38, 0.0 }
 0x53e   :  { %2106 = vpow2.f32 %v1449_v18  ;;  %v2992_v16 = vsub.f32 %v2835_v22, %v1356_v27  ;;  %1535 = vadd.xlane.f32.xlu1 %v1534_v20 }
 0x540   :  { %v2103_v9 = vpop.eup %2102  ;;  %v1451_v10 = vmul.f32 1.442695, %v2992_v16 }
 0x541   :  { %v1537_v28 = vsel %vm1260_vm1, %v2103_v9, 0.0 }
 0x542   :  { %2108 = vpow2.f32 %v1451_v10  ;;  %1538 = vadd.xlane.f32.xlu0 %v1537_v28 }
 0x544   :  { %v2105_v25 = vpop.eup %2104 }
 0x545   :  { %v1540_v29 = vsel %vm1260_vm1, %v2105_v25, 0.0 }
 0x546   :  { %1541 = vadd.xlane.f32.xlu1 %v1540_v29 }
 0x548   :  { %v2107_v32 = vpop.eup %2106 }
 0x549   :  { %v1543_v34 = vsel %vm1260_vm1, %v2107_v32, 0.0 }
 0x54a   :  { %1544 = vadd.xlane.f32.xlu0 %v1543_v34 }
 0x54c   :  { %v2109_v37 = vpop.eup %2108 }
 0x54d   :  { %v1546_v22 = vsel %vm1260_vm1, %v2109_v37, 0.0 }
 0x54e   :  { %1547 = vadd.xlane.f32.xlu1 %v1546_v22 }
 0x55f   :  { %v1455_v40 = vpop.xlane.xlu0 %1454 }
 0x560   :  { %2110 = vlog2.f32 %v1455_v40 }
 0x563   :  { %v1458_v43 = vpop.xlane.xlu1 %1457 }
 0x564   :  { %2112 = vlog2.f32 %v1458_v43 }
 0x567   :  { %v1461_v44 = vpop.xlane.xlu0 %1460 }
 0x568   :  { %2114 = vlog2.f32 %v1461_v44 }
 0x56a   :  { %v2111_v47 = vpop.eup %2110 }
 0x56b   :  { %v1550_v45 = vmul.f32 0.6931472, %v2111_v47  ;;  %v1464_v48 = vpop.xlane.xlu1 %1463 }
 0x56c   :  { %2116 = vlog2.f32 %v1464_v48 }
 0x56d   :  { %v1613_v52 = vsub.f32 %v2840_v19, %v1550_v45 }
 0x56e   :  { %v2113_v53 = vpop.eup %2112 }
 0x56f   :  { %1645 = vst.msk [vmem:[%s3163_s4] sm:$0xff] %vm1260_vm1, %v1613_v52  ;;  %v1552_v56 = vmul.f32 0.6931472, %v2113_v53  ;;  %v1467_v58 = vpop.xlane.xlu0 %1466 }
 0x570   :  { %2118 = vlog2.f32 %v1467_v58 }
 0x571   :  { %v1614_v61 = vsub.f32 %v2844_v31, %v1552_v56 }
 0x572   :  { %v2115_v62 = vpop.eup %2114 }
 0x573   :  { %1646 = vst.msk [vmem:[%s3163_s4 + $0x8] sm:$0xff] %vm1260_vm1, %v1614_v61  ;;  %v1554_v1 = vmul.f32 0.6931472, %v2115_v62  ;;  %v1470_v3 = vpop.xlane.xlu1 %1469 }
 0x574   :  { %2120 = vlog2.f32 %v1470_v3 }
 0x575   :  { %v1615_v19 = vsub.f32 %v2848_v35, %v1554_v1 }
 0x576   :  { %v2117_v6 = vpop.eup %2116 }
 0x577   :  { %1647 = vst.msk [vmem:[%s3163_s4 + $0x10] sm:$0xff] %vm1260_vm1, %v1615_v19  ;;  %v1556_v7 = vmul.f32 0.6931472, %v2117_v6  ;;  %v1473_v13 = vpop.xlane.xlu0 %1472 }
 0x578   :  { %2122 = vlog2.f32 %v1473_v13 }
 0x579   :  { %v1616_v31 = vsub.f32 %v2852_v42, %v1556_v7 }
 0x57a   :  { %v2119_v15 = vpop.eup %2118 }
 0x57b   :  { %1648 = vst.msk [vmem:[%s3163_s4 + $0x18] sm:$0xff] %vm1260_vm1, %v1616_v31  ;;  %v1558_v23 = vmul.f32 0.6931472, %v2119_v15  ;;  %v1476_v38 = vpop.xlane.xlu1 %1475 }
 0x57c   :  { %2124 = vlog2.f32 %v1476_v38 }
 0x57d   :  { %v1617_v35 = vsub.f32 %v2857_v49, %v1558_v23 }
 0x57e   :  { %v2121_v18 = vpop.eup %2120 }
 0x57f   :  { %1649 = vst.msk [vmem:[%s3163_s4 + $0x20] sm:$0xff] %vm1260_vm1, %v1617_v35  ;;  %v1560_v27 = vmul.f32 0.6931472, %v2121_v18  ;;  %v1479_v20 = vpop.xlane.xlu0 %1478 }
 0x580   :  { %2126 = vlog2.f32 %v1479_v20 }
 0x581   :  { %v1618_v42 = vsub.f32 %v2862_v51, %v1560_v27 }
 0x582   :  { %v2123_v9 = vpop.eup %2122 }
 0x583   :  { %1650 = vst.msk [vmem:[%s3163_s4 + $0x28] sm:$0xff] %vm1260_vm1, %v1618_v42  ;;  %v1562_v10 = vmul.f32 0.6931472, %v2123_v9  ;;  %v1482_v28 = vpop.xlane.xlu1 %1481 }
 0x584   :  { %2128 = vlog2.f32 %v1482_v28 }
 0x585   :  { %v1619_v49 = vsub.f32 %v2867_v54, %v1562_v10 }
 0x586   :  { %v2125_v25 = vpop.eup %2124 }
 0x587   :  { %1651 = vst.msk [vmem:[%s3163_s4 + $0x30] sm:$0xff] %vm1260_vm1, %v1619_v49  ;;  %v1564_v29 = vmul.f32 0.6931472, %v2125_v25  ;;  %v1485_v32 = vpop.xlane.xlu0 %1484 }
 0x588   :  { %2130 = vlog2.f32 %v1485_v32 }
 0x589   :  { %v1620_v51 = vsub.f32 %v2872_v57, %v1564_v29 }
 0x58a   :  { %v2127_v34 = vpop.eup %2126 }
 0x58b   :  { %1652 = vst.msk [vmem:[%s3163_s4 + $0x38] sm:$0xff] %vm1260_vm1, %v1620_v51  ;;  %v1566_v37 = vmul.f32 0.6931472, %v2127_v34  ;;  %v1488_v22 = vpop.xlane.xlu1 %1487 }
 0x58c   :  { %2132 = vlog2.f32 %v1488_v22 }
 0x58d   :  { %v1621_v54 = vsub.f32 %v2877_v60, %v1566_v37 }
 0x58e   :  { %v2129_v40 = vpop.eup %2128 }
 0x58f   :  { %1653 = vst.msk [vmem:[%s3163_s4 + $0x40] sm:$0xff] %vm1260_vm1, %v1621_v54  ;;  %v1568_v43 = vmul.f32 0.6931472, %v2129_v40  ;;  %v1491_v44 = vpop.xlane.xlu0 %1490 }
 0x590   :  { %2134 = vlog2.f32 %v1491_v44 }
 0x591   :  { %v1622_v57 = vsub.f32 %v2882_v63, %v1568_v43 }
 0x592   :  { %v2131_v47 = vpop.eup %2130 }
 0x593   :  { %1654 = vst.msk [vmem:[%s3163_s4 + $0x48] sm:$0xff] %vm1260_vm1, %v1622_v57  ;;  %v1570_v45 = vmul.f32 0.6931472, %v2131_v47  ;;  %v1494_v48 = vpop.xlane.xlu1 %1493 }
 0x594   :  { %2136 = vlog2.f32 %v1494_v48 }
 0x595   :  { %v1623_v60 = vsub.f32 %v2887_v2, %v1570_v45 }
 0x596   :  { %v2133_v52 = vpop.eup %2132 }
 0x597   :  { %1655 = vst.msk [vmem:[%s3163_s4 + $0x50] sm:$0xff] %vm1260_vm1, %v1623_v60  ;;  %v1572_v53 = vmul.f32 0.6931472, %v2133_v52  ;;  %v1497_v56 = vpop.xlane.xlu0 %1496 }
 0x598   :  { %2138 = vlog2.f32 %v1497_v56 }
 0x599   :  { %v1624_v63 = vsub.f32 %v2892_v5, %v1572_v53 }
 0x59a   :  { %v2135_v58 = vpop.eup %2134 }
 0x59b   :  { %1656 = vst.msk [vmem:[%s3163_s4 + $0x58] sm:$0xff] %vm1260_vm1, %v1624_v63  ;;  %v1574_v61 = vmul.f32 0.6931472, %v2135_v58  ;;  %v1500_v62 = vpop.xlane.xlu1 %1499 }
 0x59c   :  { %2140 = vlog2.f32 %v1500_v62 }
 0x59d   :  { %v1625_v2 = vsub.f32 %v2897_v8, %v1574_v61 }
 0x59e   :  { %v2137_v1 = vpop.eup %2136 }
 0x59f   :  { %1657 = vst.msk [vmem:[%s3163_s4 + $0x60] sm:$0xff] %vm1260_vm1, %v1625_v2  ;;  %v1576_v3 = vmul.f32 0.6931472, %v2137_v1  ;;  %v1503_v19 = vpop.xlane.xlu0 %1502 }
 0x5a0   :  { %2142 = vlog2.f32 %v1503_v19 }
 0x5a1   :  { %v1626_v5 = vsub.f32 %v2902_v14, %v1576_v3 }
 0x5a2   :  { %v2139_v6 = vpop.eup %2138 }
 0x5a3   :  { %1658 = vst.msk [vmem:[%s3163_s4 + $0x68] sm:$0xff] %vm1260_vm1, %v1626_v5  ;;  %v1578_v7 = vmul.f32 0.6931472, %v2139_v6  ;;  %v1506_v13 = vpop.xlane.xlu1 %1505 }
 0x5a4   :  { %2144 = vlog2.f32 %v1506_v13 }
 0x5a5   :  { %v1627_v8 = vsub.f32 %v2907_v17, %v1578_v7 }
 0x5a6   :  { %v2141_v31 = vpop.eup %2140 }
 0x5a7   :  { %1659 = vst.msk [vmem:[%s3163_s4 + $0x70] sm:$0xff] %vm1260_vm1, %v1627_v8  ;;  %v1580_v15 = vmul.f32 0.6931472, %v2141_v31  ;;  %v1509_v23 = vpop.xlane.xlu0 %1508 }
 0x5a8   :  { %2146 = vlog2.f32 %v1509_v23 }
 0x5a9   :  { %v1628_v14 = vsub.f32 %v2912_v39, %v1580_v15 }
 0x5aa   :  { %v2143_v38 = vpop.eup %2142 }
 0x5ab   :  { %1660 = vst.msk [vmem:[%s3163_s4 + $0x78] sm:$0xff] %vm1260_vm1, %v1628_v14  ;;  %v1582_v35 = vmul.f32 0.6931472, %v2143_v38  ;;  %v1512_v18 = vpop.xlane.xlu1 %1511 }
 0x5ac   :  { %2148 = vlog2.f32 %v1512_v18 }
 0x5ad   :  { %v1629_v17 = vsub.f32 %v2917_v24, %v1582_v35 }
 0x5ae   :  { %v2145_v27 = vpop.eup %2144 }
 0x5af   :  { %1661 = vst.msk [vmem:[%s3163_s4 + $0x80] sm:$0xff] %vm1260_vm1, %v1629_v17  ;;  %v1584_v20 = vmul.f32 0.6931472, %v2145_v27  ;;  %v1515_v42 = vpop.xlane.xlu0 %1514 }
 0x5b0   :  { %2150 = vlog2.f32 %v1515_v42 }
 0x5b1   :  { %v1630_v39 = vsub.f32 %v2922_v21, %v1584_v20 }
 0x5b2   :  { %v2147_v9 = vpop.eup %2146 }
 0x5b3   :  { %1662 = vst.msk [vmem:[%s3163_s4 + $0x88] sm:$0xff] %vm1260_vm1, %v1630_v39  ;;  %v1586_v10 = vmul.f32 0.6931472, %v2147_v9  ;;  %v1518_v28 = vpop.xlane.xlu1 %1517 }
 0x5b4   :  { %2152 = vlog2.f32 %v1518_v28 }
 0x5b5   :  { %v1631_v24 = vsub.f32 %v2927_v11, %v1586_v10 }
 0x5b6   :  { %v2149_v49 = vpop.eup %2148 }
 0x5b7   :  { %1663 = vst.msk [vmem:[%s3163_s4 + $0x90] sm:$0xff] %vm1260_vm1, %v1631_v24  ;;  %v1588_v25 = vmul.f32 0.6931472, %v2149_v49  ;;  %v1521_v29 = vpop.xlane.xlu0 %1520 }
 0x5b8   :  { %2154 = vlog2.f32 %v1521_v29 }
 0x5b9   :  { %v1632_v21 = vsub.f32 %v2932_v26, %v1588_v25 }
 0x5ba   :  { %v2151_v32 = vpop.eup %2150 }
 0x5bb   :  { %1664 = vst.msk [vmem:[%s3163_s4 + $0x98] sm:$0xff] %vm1260_vm1, %v1632_v21  ;;  %v1590_v51 = vmul.f32 0.6931472, %v2151_v32  ;;  %v1524_v34 = vpop.xlane.xlu1 %1523 }
 0x5bc   :  { %2156 = vlog2.f32 %v1524_v34 }
 0x5bd   :  { %v1633_v11 = vsub.f32 %v2937_v30, %v1590_v51 }
 0x5be   :  { %v2153_v37 = vpop.eup %2152 }
 0x5bf   :  { %1665 = vst.msk [vmem:[%s3163_s4 + $0xa0] sm:$0xff] %vm1260_vm1, %v1633_v11  ;;  %v1592_v22 = vmul.f32 0.6931472, %v2153_v37  ;;  %v1527_v54 = vpop.xlane.xlu0 %1526 }
 0x5c0   :  { %2158 = vlog2.f32 %v1527_v54 }
 0x5c1   :  { %v1634_v26 = vsub.f32 %v2942_v33, %v1592_v22 }
 0x5c2   :  { %v2155_v40 = vpop.eup %2154 }
 0x5c3   :  { %1666 = vst.msk [vmem:[%s3163_s4 + $0xa8] sm:$0xff] %vm1260_vm1, %v1634_v26  ;;  %v1594_v43 = vmul.f32 0.6931472, %v2155_v40  ;;  %v1530_v44 = vpop.xlane.xlu1 %1529 }
 0x5c4   :  { %2160 = vlog2.f32 %v1530_v44 }
 0x5c5   :  { %v1635_v30 = vsub.f32 %v2947_v36, %v1594_v43 }
 0x5c6   :  { %v2157_v57 = vpop.eup %2156 }
 0x5c7   :  { %1667 = vst.msk [vmem:[%s3163_s4 + $0xb0] sm:$0xff] %vm1260_vm1, %v1635_v30  ;;  %v1596_v47 = vmul.f32 0.6931472, %v2157_v57  ;;  %v1533_v45 = vpop.xlane.xlu0 %1532 }
 0x5c8   :  { %2162 = vlog2.f32 %v1533_v45 }
 0x5c9   :  { %v1636_v33 = vsub.f32 %v2952_v41, %v1596_v47 }
 0x5ca   :  { %v2159_v48 = vpop.eup %2158 }
 0x5cb   :  { %1668 = vst.msk [vmem:[%s3163_s4 + $0xb8] sm:$0xff] %vm1260_vm1, %v1636_v33  ;;  %v1598_v60 = vmul.f32 0.6931472, %v2159_v48  ;;  %v1536_v52 = vpop.xlane.xlu1 %1535 }
 0x5cc   :  { %2164 = vlog2.f32 %v1536_v52 }
 0x5cd   :  { %v1637_v36 = vsub.f32 %v2957_v46, %v1598_v60 }
 0x5ce   :  { %v2161_v53 = vpop.eup %2160 }
 0x5cf   :  { %1669 = vst.msk [vmem:[%s3163_s4 + $0xc0] sm:$0xff] %vm1260_vm1, %v1637_v36  ;;  %v1600_v56 = vmul.f32 0.6931472, %v2161_v53  ;;  %v1539_v63 = vpop.xlane.xlu0 %1538 }
 0x5d0   :  { %2166 = vlog2.f32 %v1539_v63 }
 0x5d1   :  { %v1638_v41 = vsub.f32 %v2962_v50, %v1600_v56 }
 0x5d2   :  { %v2163_v58 = vpop.eup %2162 }
 0x5d3   :  { %1670 = vst.msk [vmem:[%s3163_s4 + $0xc8] sm:$0xff] %vm1260_vm1, %v1638_v41  ;;  %v1602_v61 = vmul.f32 0.6931472, %v2163_v58  ;;  %v1542_v62 = vpop.xlane.xlu1 %1541 }
 0x5d4   :  { %2168 = vlog2.f32 %v1542_v62 }
 0x5d5   :  { %v1639_v46 = vsub.f32 %v2967_v55, %v1602_v61 }
 0x5d6   :  { %v2165_v2 = vpop.eup %2164 }
 0x5d7   :  { %1671 = vst.msk [vmem:[%s3163_s4 + $0xd0] sm:$0xff] %vm1260_vm1, %v1639_v46  ;;  %v1604_v1 = vmul.f32 0.6931472, %v2165_v2  ;;  %v1545_v3 = vpop.xlane.xlu0 %1544 }
 0x5d8   :  { %2170 = vlog2.f32 %v1545_v3 }
 0x5d9   :  { %v1640_v50 = vsub.f32 %v2972_v59, %v1604_v1 }
 0x5da   :  { %v2167_v19 = vpop.eup %2166 }
 0x5db   :  { %1672 = vst.msk [vmem:[%s3163_s4 + $0xd8] sm:$0xff] %vm1260_vm1, %v1640_v50  ;;  %v1606_v5 = vmul.f32 0.6931472, %v2167_v19  ;;  %v1548_v6 = vpop.xlane.xlu1 %1547 }
 0x5dc   :  { %2172 = vlog2.f32 %v1548_v6 }
 0x5dd   :  { %v1641_v55 = vsub.f32 %v2977_v0, %v1606_v5 }
 0x5de   :  { %v2169_v7 = vpop.eup %2168 }
 0x5df   :  { %1673 = vst.msk [vmem:[%s3163_s4 + $0xe0] sm:$0xff] %vm1260_vm1, %v1641_v55  ;;  %v1608_v13 = vmul.f32 0.6931472, %v2169_v7 }
 0x5e1   :  { %v1642_v59 = vsub.f32 %v2982_v4, %v1608_v13 }
 0x5e2   :  { %v2171_v8 = vpop.eup %2170 }
 0x5e3   :  { %1674 = vst.msk [vmem:[%s3163_s4 + $0xe8] sm:$0xff] %vm1260_vm1, %v1642_v59  ;;  %v1610_v31 = vmul.f32 0.6931472, %v2171_v8 }
 0x5e5   :  { %v1643_v15 = vsub.f32 %v2987_v12, %v1610_v31 }
 0x5e6   :  { %v2173_v23 = vpop.eup %2172 }
 0x5e7   :  { %1675 = vst.msk [vmem:[%s3163_s4 + $0xf0] sm:$0xff] %vm1260_vm1, %v1643_v15  ;;  %v1612_v0 = vmul.f32 0.6931472, %v2173_v23 }
 0x5e9   :  { %v1644_v14 = vsub.f32 %v2992_v16, %v1612_v0 }
 0x5eb   :  { %1676 = vst.msk [vmem:[%s3163_s4 + $0xf8] sm:$0xff] %vm1260_vm1, %v1644_v14 }
 0x5ec   :  { %1681 = vsyncpa [#allocation3], 1 }

</bundles_post_ra>
